<compile_context>
chip_gen: v6e
topology: v6e:2x2x1
jax: 0.10.0
libtpu: 0.0.40
codegen_flags: <defaults>
</compile_context>

<pallas_src>
import jax
import jax.numpy as jnp
from jax.experimental import pallas as pl
from jax.experimental.pallas import tpu as pltpu

# ----------------------------- small synthetic config -------------------------
VOCAB = 128          # synthetic GPT-2 vocab (real: 50257)
EMBED = 32           # gpt_embedding_size (real: 768)
N_HEAD = 4           # (real: 12)
N_LAYER = 2          # (real: 12)
MAX_POS = 16
PREFIX_LEN = 4       # prefix_length
CLIP_IN = 64         # raw clip feature dim fed to prefix_dim_reduction (real: 1024)
PREFIX_SIZE = 32     # reduced clip dim == MLP input size (real: 512)
BATCH = 2
SEQ = 8              # number of caption tokens
S_TOTAL = PREFIX_LEN + SEQ
HEAD_D = EMBED // N_HEAD
HID = EMBED * PREFIX_LEN // 2
OUT = EMBED * PREFIX_LEN
LN_EPS = 1e-5
NEG_MASK = -1e9      # finite (bf16/f32-safe) causal-mask fill


# ----------------------------- in-kernel helpers -------------------------------
def _layernorm(x, g, b):
    mu = jnp.mean(x, axis=-1, keepdims=True)
    var = jnp.mean(jnp.square(x - mu), axis=-1, keepdims=True)
    return (x - mu) * jax.lax.rsqrt(var + LN_EPS) * g + b


def _gelu(x):
    # GPT-2 "gelu_new" (tanh approximation); tanh lands on the EUP slot.
    return 0.5 * x * (1.0 + jnp.tanh(0.7978845608028654 * (x + 0.044715 * x * x * x)))


def _split_heads(x):
    # (B*S, E) with head-major columns -> (B*H, S, D). Pure slice/stack (XLU work).
    parts = []
    for b in range(BATCH):
        xb = x[b * S_TOTAL:(b + 1) * S_TOTAL, :]          # (S, E)
        for h in range(N_HEAD):
            parts.append(xb[:, h * HEAD_D:(h + 1) * HEAD_D])   # (S, D)
    return jnp.stack(parts, axis=0)                       # (B*H, S, D)


def _merge_heads(ctx):
    # (B*H, S, D) -> (B*S, E): concat heads on lanes, batches on rows.
    rows = []
    for b in range(BATCH):
        rows.append(jnp.concatenate(
            [ctx[b * N_HEAD + h] for h in range(N_HEAD)], axis=-1))     # (S, E)
    return jnp.concatenate(rows, axis=0)                  # (B*S, E)


# ----------------------------- fused kernel ------------------------------------
# grid = (N_LAYER,). Hidden state (B*S, E) carried across layers in VMEM scratch.
# Layer 0: embedding + prefix MLP + positional add.  Last layer: ln_f + tied LM head.
def _clipcap_kernel(
        tok_ref, prefix_ref, wte_ref, wpe_ref,
        red_w_ref, red_b_ref, m1_w_ref, m1_b_ref, m2_w_ref, m2_b_ref,
        ln1_g_ref, ln1_b_ref, wqkv_ref, bqkv_ref, wproj_ref, bproj_ref,
        ln2_g_ref, ln2_b_ref, fc_w_ref, fc_b_ref, mp_w_ref, mp_b_ref,
        lnf_g_ref, lnf_b_ref,
        logits_ref, h_ref):
    l = pl.program_id(0)
    S, E, H, D = S_TOTAL, EMBED, N_HEAD, HEAD_D
    P, T = PREFIX_LEN, SEQ
    scale = 1.0 / (float(D) ** 0.5)
    bf16 = jnp.bfloat16

    # ---------------- layer-0 init: inputs_embeds + positional embeddings --------
    @pl.when(l == 0)
    def _init():
        # token embedding via one-hot matmul (VOCAB = 128 -> lane-aligned contraction)
        # TODO(synk): at real vocab use a scalar-prefetch row gather instead.
        tok = tok_ref[...]                                          # (B*T, 1) int32
        onehot = (tok == jax.lax.broadcasted_iota(
            jnp.int32, (BATCH * T, VOCAB), 1)).astype(bf16)
        emb = jnp.dot(onehot, wte_ref[...],
                      preferred_element_type=jnp.float32)           # (B*T, E) f32

        # prefix path: Linear(CLIP_IN -> PREFIX_SIZE) -> Linear -> tanh -> Linear
        tp = jnp.dot(prefix_ref[...].astype(bf16), red_w_ref[...],
                     preferred_element_type=jnp.float32) + red_b_ref[...]
        h1 = jnp.tanh(jnp.dot(tp.astype(bf16), m1_w_ref[...],
                              preferred_element_type=jnp.float32) + m1_b_ref[...])
        proj = jnp.dot(h1.astype(bf16), m2_w_ref[...],
                       preferred_element_type=jnp.float32) + m2_b_ref[...]   # (B, P*E)

        pos = wpe_ref[0:S, :]                                        # (S, E) f32
        for b in range(BATCH):
            # embedding_cat rows [0, P) = prefix projections, rows [P, S) = text
            pref_b = jnp.concatenate(
                [proj[b:b + 1, p * E:(p + 1) * E] for p in range(P)], axis=0)  # (P, E)
            h_ref[b * S:b * S + P, :] = pref_b + pos[0:P, :]
            h_ref[b * S + P:(b + 1) * S, :] = emb[b * T:(b + 1) * T, :] + pos[P:S, :]

    h = h_ref[...]                                                   # (B*S, E) f32

    # ---------------- attention sub-block ----------------
    ln1 = _layernorm(h, ln1_g_ref[0], ln1_b_ref[0])
    # single fused QKV matmul: (B*S, E) @ (E, 3E)  (columns: [Wq | Wk | Wv], head-major)
    qkv = jnp.dot(ln1.astype(bf16), wqkv_ref[0],
                  preferred_element_type=jnp.float32) + bqkv_ref[0]  # (B*S, 3E) f32
    q = _split_heads(qkv[:, 0:E])                                    # (B*H, S, D)
    k = _split_heads(qkv[:, E:2 * E])
    v = _split_heads(qkv[:, 2 * E:3 * E])

    scores = jnp.einsum("gsd,gtd->gst", q.astype(bf16), k.astype(bf16),
                        preferred_element_type=jnp.float32) * scale  # (B*H, S, S) f32
    row = jax.lax.broadcasted_iota(jnp.int32, (S, S), 0)
    col = jax.lax.broadcasted_iota(jnp.int32, (S, S), 1)
    scores = jnp.where((col <= row)[None, :, :], scores, NEG_MASK)
    scores = scores - jnp.max(scores, axis=-1, keepdims=True)
    p = jnp.exp(scores)
    p = p * pl.reciprocal(jnp.sum(p, axis=-1, keepdims=True), approx=True)
    ctx = jnp.einsum("gst,gtd->gsd", p.astype(bf16), v.astype(bf16),
                     preferred_element_type=jnp.float32)             # (B*H, S, D)
    # single output projection: (B*S, E) @ (E, E)
    attn = jnp.dot(_merge_heads(ctx).astype(bf16), wproj_ref[0],
                   preferred_element_type=jnp.float32) + bproj_ref[0]
    h = h + attn                                                     # residual

    # ---------------- MLP sub-block ----------------
    ln2 = _layernorm(h, ln2_g_ref[0], ln2_b_ref[0])
    m = jnp.dot(ln2.astype(bf16), fc_w_ref[0],
                preferred_element_type=jnp.float32) + fc_b_ref[0]
    m = _gelu(m)
    m = jnp.dot(m.astype(bf16), mp_w_ref[0],
                preferred_element_type=jnp.float32) + mp_b_ref[0]
    h = h + m                                                        # residual
    h_ref[...] = h

    # ---------------- final layer: ln_f + tied LM head ----------------
    @pl.when(l == pl.num_programs(0) - 1)
    def _finalize():
        hn = _layernorm(h, lnf_g_ref[...], lnf_b_ref[...])
        # tied LM head: logits = ln_f(h) @ wte^T, contracting wte's stored (V, E) layout
        # TODO(synk): vocab-tile this matmul at real vocab (pad 50257 -> 50304).
        logits = jax.lax.dot_general(
            hn.astype(bf16), wte_ref[...],
            dimension_numbers=(((1,), (1,)), ((), ())),
            preferred_element_type=jnp.float32)                      # (B*S, V) lane-dense
        for b in range(BATCH):
            logits_ref[b] = logits[b * S:(b + 1) * S, :]


# ----------------------------- wrapper -----------------------------------------
def clip_caption_forward(params, tokens, prefix):
    B, T = tokens.shape
    S = PREFIX_LEN + T
    tok_flat = tokens.reshape(B * T, 1).astype(jnp.int32)

    def shared(arr):
        r = arr.ndim
        return pl.BlockSpec(arr.shape, lambda l, _r=r: (0,) * _r)

    def per_layer(arr):
        r = arr.ndim
        return pl.BlockSpec((1,) + arr.shape[1:],
                            lambda l, _r=r: (l,) + (0,) * (_r - 1))

    args = (tok_flat, prefix,
            params["wte"], params["wpe"],
            params["red_w"], params["red_b"],
            params["mlp1_w"], params["mlp1_b"],
            params["mlp2_w"], params["mlp2_b"],
            params["ln1_g"], params["ln1_b"],
            params["w_qkv"], params["b_qkv"],
            params["w_proj"], params["b_proj"],
            params["ln2_g"], params["ln2_b"],
            params["fc_w"], params["fc_b"],
            params["mp_w"], params["mp_b"],
            params["lnf_g"], params["lnf_b"])

    in_specs = ([shared(a) for a in args[:10]]            # prep inputs (layer-invariant)
                + [per_layer(a) for a in args[10:22]]     # per-layer GPT-2 weights
                + [shared(a) for a in args[22:]])         # ln_f

    return pl.pallas_call(
        _clipcap_kernel,
        out_shape=jax.ShapeDtypeStruct((B, S, VOCAB), jnp.float32),
        grid=(N_LAYER,),
        in_specs=in_specs,
        out_specs=pl.BlockSpec((B, S, VOCAB), lambda l: (0, 0, 0)),
        scratch_shapes=[pltpu.VMEM((B * S, EMBED), jnp.float32)],
        compiler_params=pltpu.CompilerParams(
            dimension_semantics=("arbitrary",)),
    )(*args)


# ----------------------------- parameter init ---------------------------------
def init_params(key):
    def wbf16(k, shape, scale=0.02):
        return (scale * jax.random.normal(k, shape, dtype=jnp.float32)).astype(jnp.bfloat16)

    def wf32(k, shape, scale=0.02):
        return scale * jax.random.normal(k, shape, dtype=jnp.float32)

    keys = iter(jax.random.split(key, 9))
    p = {}
    # GPT-2 embeddings (wte in bf16: used as matmul operand for embed + LM head)
    p["wte"] = wbf16(next(keys), (VOCAB, EMBED))
    p["wpe"] = wf32(next(keys), (MAX_POS, EMBED))
    # prefix_dim_reduction: Linear(CLIP_IN -> PREFIX_SIZE)
    p["red_w"] = wbf16(next(keys), (CLIP_IN, PREFIX_SIZE))
    p["red_b"] = jnp.zeros((1, PREFIX_SIZE), jnp.float32)
    # clip_project MLP: (PREFIX_SIZE, E*P/2 [tanh], E*P)
    p["mlp1_w"] = wbf16(next(keys), (PREFIX_SIZE, HID))
    p["mlp1_b"] = jnp.zeros((1, HID), jnp.float32)
    p["mlp2_w"] = wbf16(next(keys), (HID, OUT))
    p["mlp2_b"] = jnp.zeros((1, OUT), jnp.float32)
    # GPT-2 blocks, stacked along a leading layer axis.
    # w_qkv columns: [Wq | Wk | Wv], each E wide, head-major inside each block.
    p["ln1_g"] = jnp.ones((N_LAYER, 1, EMBED), jnp.float32)
    p["ln1_b"] = jnp.zeros((N_LAYER, 1, EMBED), jnp.float32)
    p["w_qkv"] = wbf16(next(keys), (N_LAYER, EMBED, 3 * EMBED))
    p["b_qkv"] = jnp.zeros((N_LAYER, 1, 3 * EMBED), jnp.float32)
    p["w_proj"] = wbf16(next(keys), (N_LAYER, EMBED, EMBED))
    p["b_proj"] = jnp.zeros((N_LAYER, 1, EMBED), jnp.float32)
    p["ln2_g"] = jnp.ones((N_LAYER, 1, EMBED), jnp.float32)
    p["ln2_b"] = jnp.zeros((N_LAYER, 1, EMBED), jnp.float32)
    p["fc_w"] = wbf16(next(keys), (N_LAYER, EMBED, 4 * EMBED))
    p["fc_b"] = jnp.zeros((N_LAYER, 1, 4 * EMBED), jnp.float32)
    p["mp_w"] = wbf16(next(keys), (N_LAYER, 4 * EMBED, EMBED))
    p["mp_b"] = jnp.zeros((N_LAYER, 1, EMBED), jnp.float32)
    p["lnf_g"] = jnp.ones((1, EMBED), jnp.float32)
    p["lnf_b"] = jnp.zeros((1, EMBED), jnp.float32)
    return p


# ----------------------------- main ---------------------------------------------
if __name__ == "__main__":
    key = jax.random.PRNGKey(0)
    k_params, k_tok, k_pref = jax.random.split(key, 3)
    params = init_params(k_params)
    tokens = jax.random.randint(k_tok, (BATCH, SEQ), 0, VOCAB, dtype=jnp.int32)
    prefix = jax.random.normal(k_pref, (BATCH, CLIP_IN), dtype=jnp.float32)

    fwd = jax.jit(clip_caption_forward)
    logits = jax.block_until_ready(fwd(params, tokens, prefix))

    assert logits.shape == (BATCH, PREFIX_LEN + SEQ, VOCAB)
    assert bool(jnp.all(jnp.isfinite(logits)))
    print("KERNEL_OK")
</pallas_src>

<mosaic_0001>
module attributes {stable_mosaic.version = 11 : i64} {
  func.func @_clipcap_kernel(%arg0: i32, %arg1: memref<16x1xi32, #tpu.memory_space<vmem>>, %arg2: memref<2x64xf32, #tpu.memory_space<vmem>>, %arg3: memref<128x32xbf16, #tpu.memory_space<vmem>>, %arg4: memref<16x32xf32, #tpu.memory_space<vmem>>, %arg5: memref<64x32xbf16, #tpu.memory_space<vmem>>, %arg6: memref<1x32xf32, #tpu.memory_space<vmem>>, %arg7: memref<32x64xbf16, #tpu.memory_space<vmem>>, %arg8: memref<1x64xf32, #tpu.memory_space<vmem>>, %arg9: memref<64x128xbf16, #tpu.memory_space<vmem>>, %arg10: memref<1x128xf32, #tpu.memory_space<vmem>>, %arg11: memref<1x1x32xf32, #tpu.memory_space<vmem>>, %arg12: memref<1x1x32xf32, #tpu.memory_space<vmem>>, %arg13: memref<1x32x96xbf16, #tpu.memory_space<vmem>>, %arg14: memref<1x1x96xf32, #tpu.memory_space<vmem>>, %arg15: memref<1x32x32xbf16, #tpu.memory_space<vmem>>, %arg16: memref<1x1x32xf32, #tpu.memory_space<vmem>>, %arg17: memref<1x1x32xf32, #tpu.memory_space<vmem>>, %arg18: memref<1x1x32xf32, #tpu.memory_space<vmem>>, %arg19: memref<1x32x128xbf16, #tpu.memory_space<vmem>>, %arg20: memref<1x1x128xf32, #tpu.memory_space<vmem>>, %arg21: memref<1x128x32xbf16, #tpu.memory_space<vmem>>, %arg22: memref<1x1x32xf32, #tpu.memory_space<vmem>>, %arg23: memref<1x32xf32, #tpu.memory_space<vmem>>, %arg24: memref<1x32xf32, #tpu.memory_space<vmem>>, %arg25: memref<2x12x128xf32, #tpu.memory_space<vmem>>, %arg26: memref<24x32xf32, #tpu.memory_space<vmem>>) attributes {dimension_semantics = [#tpu.dimension_semantics<arbitrary>], iteration_bounds = array<i64: 2>, scalar_prefetch = 0 : i64, scratch_operands = 1 : i64, tpu.core_type = #tpu.core_type<tc>, window_params = [{pipeline_mode = #tpu.pipeline_mode<synchronous>, transform_indices = @transform_0, window_bounds = array<i64: 16, 1>}, {pipeline_mode = #tpu.pipeline_mode<synchronous>, transform_indices = @transform_1, window_bounds = array<i64: 2, 64>}, {pipeline_mode = #tpu.pipeline_mode<synchronous>, transform_indices = @transform_2, window_bounds = array<i64: 128, 32>}, {pipeline_mode = #tpu.pipeline_mode<synchronous>, transform_indices = @transform_3, window_bounds = array<i64: 16, 32>}, {pipeline_mode = #tpu.pipeline_mode<synchronous>, transform_indices = @transform_4, window_bounds = array<i64: 64, 32>}, {pipeline_mode = #tpu.pipeline_mode<synchronous>, transform_indices = @transform_5, window_bounds = array<i64: 1, 32>}, {pipeline_mode = #tpu.pipeline_mode<synchronous>, transform_indices = @transform_6, window_bounds = array<i64: 32, 64>}, {pipeline_mode = #tpu.pipeline_mode<synchronous>, transform_indices = @transform_7, window_bounds = array<i64: 1, 64>}, {pipeline_mode = #tpu.pipeline_mode<synchronous>, transform_indices = @transform_8, window_bounds = array<i64: 64, 128>}, {pipeline_mode = #tpu.pipeline_mode<synchronous>, transform_indices = @transform_9, window_bounds = array<i64: 1, 128>}, {transform_indices = @transform_10, window_bounds = array<i64: 1, 1, 32>}, {transform_indices = @transform_11, window_bounds = array<i64: 1, 1, 32>}, {transform_indices = @transform_12, window_bounds = array<i64: 1, 32, 96>}, {transform_indices = @transform_13, window_bounds = array<i64: 1, 1, 96>}, {transform_indices = @transform_14, window_bounds = array<i64: 1, 32, 32>}, {transform_indices = @transform_15, window_bounds = array<i64: 1, 1, 32>}, {transform_indices = @transform_16, window_bounds = array<i64: 1, 1, 32>}, {transform_indices = @transform_17, window_bounds = array<i64: 1, 1, 32>}, {transform_indices = @transform_18, window_bounds = array<i64: 1, 32, 128>}, {transform_indices = @transform_19, window_bounds = array<i64: 1, 1, 128>}, {transform_indices = @transform_20, window_bounds = array<i64: 1, 128, 32>}, {transform_indices = @transform_21, window_bounds = array<i64: 1, 1, 32>}, {pipeline_mode = #tpu.pipeline_mode<synchronous>, transform_indices = @transform_22, window_bounds = array<i64: 1, 32>}, {pipeline_mode = #tpu.pipeline_mode<synchronous>, transform_indices = @transform_23, window_bounds = array<i64: 1, 32>}, {pipeline_mode = #tpu.pipeline_mode<synchronous>, transform_indices = @transform_24, window_bounds = array<i64: 2, 12, 128>}]} {
    %c0_i32 = arith.constant 0 : i32
    %0 = arith.cmpi eq, %arg0, %c0_i32 : i32
    %1 = arith.extui %0 : i1 to i32
    %c0_i32_0 = arith.constant 0 : i32
    %2 = arith.cmpi ne, %1, %c0_i32_0 : i32
    scf.if %2 {
      %c0_64 = arith.constant 0 : index
      %c0_65 = arith.constant 0 : index
      %212 = vector.load %arg1[%c0_64, %c0_65] : memref<16x1xi32, #tpu.memory_space<vmem>>, vector<16x1xi32>
      %213 = tpu.iota {dimensions = array<i32: 1>} : vector<16x128xi32>
      %214 = vector.broadcast %212 : vector<16x1xi32> to vector<16x128xi32>
      %215 = arith.cmpi eq, %214, %213 : vector<16x128xi32>
      %216 = arith.extui %215 : vector<16x128xi1> to vector<16x128xi32>
      %217 = arith.sitofp %216 : vector<16x128xi32> to vector<16x128xf32>
      %218 = arith.truncf %217 : vector<16x128xf32> to vector<16x128xbf16>
      %c0_66 = arith.constant 0 : index
      %c0_67 = arith.constant 0 : index
      %219 = vector.load %arg3[%c0_66, %c0_67] : memref<128x32xbf16, #tpu.memory_space<vmem>>, vector<128x32xbf16>
      %cst_68 = arith.constant dense<0.000000e+00> : vector<16x32xf32>
      %220 = tpu.matmul %218, %219, %cst_68 {dimension_numbers = #tpu.dot_dimension_numbers<[1], [0], [0], [1], [0, 0, 1, 1], [], []>} : vector<16x128xbf16>, vector<128x32xbf16>, vector<16x32xf32> -> vector<16x32xf32>
      %c0_69 = arith.constant 0 : index
      %c0_70 = arith.constant 0 : index
      %221 = vector.load %arg2[%c0_69, %c0_70] : memref<2x64xf32, #tpu.memory_space<vmem>>, vector<2x64xf32>
      %222 = arith.truncf %221 : vector<2x64xf32> to vector<2x64xbf16>
      %c0_71 = arith.constant 0 : index
      %c0_72 = arith.constant 0 : index
      %223 = vector.load %arg5[%c0_71, %c0_72] : memref<64x32xbf16, #tpu.memory_space<vmem>>, vector<64x32xbf16>
      %cst_73 = arith.constant dense<0.000000e+00> : vector<2x32xf32>
      %224 = tpu.matmul %222, %223, %cst_73 {dimension_numbers = #tpu.dot_dimension_numbers<[1], [0], [0], [1], [0, 0, 1, 1], [], []>} : vector<2x64xbf16>, vector<64x32xbf16>, vector<2x32xf32> -> vector<2x32xf32>
      %c0_74 = arith.constant 0 : index
      %c0_75 = arith.constant 0 : index
      %225 = vector.load %arg6[%c0_74, %c0_75] : memref<1x32xf32, #tpu.memory_space<vmem>>, vector<1x32xf32>
      %226 = vector.broadcast %225 : vector<1x32xf32> to vector<2x32xf32>
      %227 = arith.addf %224, %226 : vector<2x32xf32>
      %228 = arith.truncf %227 : vector<2x32xf32> to vector<2x32xbf16>
      %c0_76 = arith.constant 0 : index
      %c0_77 = arith.constant 0 : index
      %229 = vector.load %arg7[%c0_76, %c0_77] : memref<32x64xbf16, #tpu.memory_space<vmem>>, vector<32x64xbf16>
      %cst_78 = arith.constant dense<0.000000e+00> : vector<2x64xf32>
      %230 = tpu.matmul %228, %229, %cst_78 {dimension_numbers = #tpu.dot_dimension_numbers<[1], [0], [0], [1], [0, 0, 1, 1], [], []>} : vector<2x32xbf16>, vector<32x64xbf16>, vector<2x64xf32> -> vector<2x64xf32>
      %c0_79 = arith.constant 0 : index
      %c0_80 = arith.constant 0 : index
      %231 = vector.load %arg8[%c0_79, %c0_80] : memref<1x64xf32, #tpu.memory_space<vmem>>, vector<1x64xf32>
      %232 = vector.broadcast %231 : vector<1x64xf32> to vector<2x64xf32>
      %233 = arith.addf %230, %232 : vector<2x64xf32>
      %234 = math.tanh %233 : vector<2x64xf32>
      %235 = arith.truncf %234 : vector<2x64xf32> to vector<2x64xbf16>
      %c0_81 = arith.constant 0 : index
      %c0_82 = arith.constant 0 : index
      %236 = vector.load %arg9[%c0_81, %c0_82] : memref<64x128xbf16, #tpu.memory_space<vmem>>, vector<64x128xbf16>
      %cst_83 = arith.constant dense<0.000000e+00> : vector<2x128xf32>
      %237 = tpu.matmul %235, %236, %cst_83 {dimension_numbers = #tpu.dot_dimension_numbers<[1], [0], [0], [1], [0, 0, 1, 1], [], []>} : vector<2x64xbf16>, vector<64x128xbf16>, vector<2x128xf32> -> vector<2x128xf32>
      %c0_84 = arith.constant 0 : index
      %c0_85 = arith.constant 0 : index
      %238 = vector.load %arg10[%c0_84, %c0_85] : memref<1x128xf32, #tpu.memory_space<vmem>>, vector<1x128xf32>
      %239 = vector.broadcast %238 : vector<1x128xf32> to vector<2x128xf32>
      %240 = arith.addf %237, %239 : vector<2x128xf32>
      %c0_86 = arith.constant 0 : index
      %c0_87 = arith.constant 0 : index
      %241 = vector.load %arg4[%c0_86, %c0_87] : memref<16x32xf32, #tpu.memory_space<vmem>>, vector<12x32xf32>
      %242 = vector.extract_strided_slice %240 {offsets = [0, 0], sizes = [1, 32], strides = [1, 1]} : vector<2x128xf32> to vector<1x32xf32>
      %243 = vector.extract_strided_slice %240 {offsets = [0, 32], sizes = [1, 32], strides = [1, 1]} : vector<2x128xf32> to vector<1x32xf32>
      %244 = vector.extract_strided_slice %240 {offsets = [0, 64], sizes = [1, 32], strides = [1, 1]} : vector<2x128xf32> to vector<1x32xf32>
      %245 = vector.extract_strided_slice %240 {offsets = [0, 96], sizes = [1, 32], strides = [1, 1]} : vector<2x128xf32> to vector<1x32xf32>
      %246 = tpu.concatenate %242, %243, %244, %245 in 0 : vector<1x32xf32>, vector<1x32xf32>, vector<1x32xf32>, vector<1x32xf32> -> vector<4x32xf32>
      %247 = vector.extract_strided_slice %241 {offsets = [0, 0], sizes = [4, 32], strides = [1, 1]} : vector<12x32xf32> to vector<4x32xf32>
      %248 = arith.addf %246, %247 : vector<4x32xf32>
      %c0_88 = arith.constant 0 : index
      %c0_89 = arith.constant 0 : index
      %249 = vector.load %arg26[%c0_88, %c0_89] : memref<24x32xf32, #tpu.memory_space<vmem>>, vector<4x32xf32>
      tpu.vector_store %arg26[%c0_88, %c0_89], %248 {strides = array<i32>} : memref<24x32xf32, #tpu.memory_space<vmem>>, vector<4x32xf32>,
      %250 = vector.extract_strided_slice %220 {offsets = [0, 0], sizes = [8, 32], strides = [1, 1]} : vector<16x32xf32> to vector<8x32xf32>
      %251 = vector.extract_strided_slice %241 {offsets = [4, 0], sizes = [8, 32], strides = [1, 1]} : vector<12x32xf32> to vector<8x32xf32>
      %252 = arith.addf %250, %251 : vector<8x32xf32>
      %c4 = arith.constant 4 : index
      %c0_90 = arith.constant 0 : index
      %253 = vector.load %arg26[%c4, %c0_90] : memref<24x32xf32, #tpu.memory_space<vmem>>, vector<8x32xf32>
      tpu.vector_store %arg26[%c4, %c0_90], %252 {strides = array<i32>} : memref<24x32xf32, #tpu.memory_space<vmem>>, vector<8x32xf32>,
      %254 = vector.extract_strided_slice %240 {offsets = [1, 0], sizes = [1, 32], strides = [1, 1]} : vector<2x128xf32> to vector<1x32xf32>
      %255 = vector.extract_strided_slice %240 {offsets = [1, 32], sizes = [1, 32], strides = [1, 1]} : vector<2x128xf32> to vector<1x32xf32>
      %256 = vector.extract_strided_slice %240 {offsets = [1, 64], sizes = [1, 32], strides = [1, 1]} : vector<2x128xf32> to vector<1x32xf32>
      %257 = vector.extract_strided_slice %240 {offsets = [1, 96], sizes = [1, 32], strides = [1, 1]} : vector<2x128xf32> to vector<1x32xf32>
      %258 = tpu.concatenate %254, %255, %256, %257 in 0 : vector<1x32xf32>, vector<1x32xf32>, vector<1x32xf32>, vector<1x32xf32> -> vector<4x32xf32>
      %259 = vector.extract_strided_slice %241 {offsets = [0, 0], sizes = [4, 32], strides = [1, 1]} : vector<12x32xf32> to vector<4x32xf32>
      %260 = arith.addf %258, %259 : vector<4x32xf32>
      %c12 = arith.constant 12 : index
      %c0_91 = arith.constant 0 : index
      %261 = vector.load %arg26[%c12, %c0_91] : memref<24x32xf32, #tpu.memory_space<vmem>>, vector<4x32xf32>
      tpu.vector_store %arg26[%c12, %c0_91], %260 {strides = array<i32>} : memref<24x32xf32, #tpu.memory_space<vmem>>, vector<4x32xf32>,
      %262 = vector.extract_strided_slice %220 {offsets = [8, 0], sizes = [8, 32], strides = [1, 1]} : vector<16x32xf32> to vector<8x32xf32>
      %263 = vector.extract_strided_slice %241 {offsets = [4, 0], sizes = [8, 32], strides = [1, 1]} : vector<12x32xf32> to vector<8x32xf32>
      %264 = arith.addf %262, %263 : vector<8x32xf32>
      %c16 = arith.constant 16 : index
      %c0_92 = arith.constant 0 : index
      %265 = vector.load %arg26[%c16, %c0_92] : memref<24x32xf32, #tpu.memory_space<vmem>>, vector<8x32xf32>
      tpu.vector_store %arg26[%c16, %c0_92], %264 {strides = array<i32>} : memref<24x32xf32, #tpu.memory_space<vmem>>, vector<8x32xf32>,
    } else {
    }
    %c0 = arith.constant 0 : index
    %c0_1 = arith.constant 0 : index
    %3 = vector.load %arg26[%c0, %c0_1] : memref<24x32xf32, #tpu.memory_space<vmem>>, vector<24x32xf32>
    %c0_2 = arith.constant 0 : index
    %c0_3 = arith.constant 0 : index
    %c0_4 = arith.constant 0 : index
    %4 = vector.load %arg11[%c0_2, %c0_3, %c0_4] : memref<1x1x32xf32, #tpu.memory_space<vmem>>, vector<1x1x32xf32>
    %5 = vector.shape_cast %4 : vector<1x1x32xf32> to vector<1x32xf32>
    %c0_5 = arith.constant 0 : index
    %c0_6 = arith.constant 0 : index
    %c0_7 = arith.constant 0 : index
    %6 = vector.load %arg12[%c0_5, %c0_6, %c0_7] : memref<1x1x32xf32, #tpu.memory_space<vmem>>, vector<1x1x32xf32>
    %7 = vector.shape_cast %6 : vector<1x1x32xf32> to vector<1x32xf32>
    %cst = arith.constant dense<0.000000e+00> : vector<24xf32>
    %8 = vector.multi_reduction <add>, %3, %cst [1] : vector<24x32xf32> to vector<24xf32>
    %9 = vector.shape_cast %8 : vector<24xf32> to vector<24x1xf32>
    %cst_8 = arith.constant 3.200000e+01 : f32
    %10 = vector.broadcast %cst_8 : f32 to vector<24x1xf32>
    %11 = arith.divf %9, %10 : vector<24x1xf32>
    %12 = vector.broadcast %11 : vector<24x1xf32> to vector<24x32xf32>
    %13 = arith.subf %3, %12 : vector<24x32xf32>
    %14 = arith.mulf %13, %13 : vector<24x32xf32>
    %cst_9 = arith.constant dense<0.000000e+00> : vector<24xf32>
    %15 = vector.multi_reduction <add>, %14, %cst_9 [1] : vector<24x32xf32> to vector<24xf32>
    %16 = vector.shape_cast %15 : vector<24xf32> to vector<24x1xf32>
    %cst_10 = arith.constant 3.200000e+01 : f32
    %17 = vector.broadcast %cst_10 : f32 to vector<24x1xf32>
    %18 = arith.divf %16, %17 : vector<24x1xf32>
    %19 = vector.broadcast %11 : vector<24x1xf32> to vector<24x32xf32>
    %20 = arith.subf %3, %19 : vector<24x32xf32>
    %cst_11 = arith.constant 9.99999974E-6 : f32
    %21 = vector.broadcast %cst_11 : f32 to vector<24x1xf32>
    %22 = arith.addf %18, %21 : vector<24x1xf32>
    %23 = math.rsqrt %22 : vector<24x1xf32>
    %24 = vector.broadcast %23 : vector<24x1xf32> to vector<24x32xf32>
    %25 = arith.mulf %20, %24 : vector<24x32xf32>
    %26 = vector.broadcast %5 : vector<1x32xf32> to vector<24x32xf32>
    %27 = arith.mulf %25, %26 : vector<24x32xf32>
    %28 = vector.broadcast %7 : vector<1x32xf32> to vector<24x32xf32>
    %29 = arith.addf %27, %28 : vector<24x32xf32>
    %30 = arith.truncf %29 : vector<24x32xf32> to vector<24x32xbf16>
    %c0_12 = arith.constant 0 : index
    %c0_13 = arith.constant 0 : index
    %c0_14 = arith.constant 0 : index
    %31 = vector.load %arg13[%c0_12, %c0_13, %c0_14] : memref<1x32x96xbf16, #tpu.memory_space<vmem>>, vector<1x32x96xbf16>
    %32 = vector.shape_cast %31 : vector<1x32x96xbf16> to vector<32x96xbf16>
    %cst_15 = arith.constant dense<0.000000e+00> : vector<24x96xf32>
    %33 = tpu.matmul %30, %32, %cst_15 {dimension_numbers = #tpu.dot_dimension_numbers<[1], [0], [0], [1], [0, 0, 1, 1], [], []>} : vector<24x32xbf16>, vector<32x96xbf16>, vector<24x96xf32> -> vector<24x96xf32>
    %c0_16 = arith.constant 0 : index
    %c0_17 = arith.constant 0 : index
    %c0_18 = arith.constant 0 : index
    %34 = vector.load %arg14[%c0_16, %c0_17, %c0_18] : memref<1x1x96xf32, #tpu.memory_space<vmem>>, vector<1x1x96xf32>
    %35 = vector.shape_cast %34 : vector<1x1x96xf32> to vector<1x96xf32>
    %36 = vector.broadcast %35 : vector<1x96xf32> to vector<24x96xf32>
    %37 = arith.addf %33, %36 : vector<24x96xf32>
    %38 = vector.extract_strided_slice %37 {offsets = [0, 0], sizes = [24, 32], strides = [1, 1]} : vector<24x96xf32> to vector<24x32xf32>
    %39 = vector.extract_strided_slice %38 {offsets = [0, 0], sizes = [12, 32], strides = [1, 1]} : vector<24x32xf32> to vector<12x32xf32>
    %40 = vector.extract_strided_slice %39 {offsets = [0, 0], sizes = [12, 8], strides = [1, 1]} : vector<12x32xf32> to vector<12x8xf32>
    %41 = vector.extract_strided_slice %39 {offsets = [0, 8], sizes = [12, 8], strides = [1, 1]} : vector<12x32xf32> to vector<12x8xf32>
    %42 = vector.extract_strided_slice %39 {offsets = [0, 16], sizes = [12, 8], strides = [1, 1]} : vector<12x32xf32> to vector<12x8xf32>
    %43 = vector.extract_strided_slice %39 {offsets = [0, 24], sizes = [12, 8], strides = [1, 1]} : vector<12x32xf32> to vector<12x8xf32>
    %44 = vector.extract_strided_slice %38 {offsets = [12, 0], sizes = [12, 32], strides = [1, 1]} : vector<24x32xf32> to vector<12x32xf32>
    %45 = vector.extract_strided_slice %44 {offsets = [0, 0], sizes = [12, 8], strides = [1, 1]} : vector<12x32xf32> to vector<12x8xf32>
    %46 = vector.extract_strided_slice %44 {offsets = [0, 8], sizes = [12, 8], strides = [1, 1]} : vector<12x32xf32> to vector<12x8xf32>
    %47 = vector.extract_strided_slice %44 {offsets = [0, 16], sizes = [12, 8], strides = [1, 1]} : vector<12x32xf32> to vector<12x8xf32>
    %48 = vector.extract_strided_slice %44 {offsets = [0, 24], sizes = [12, 8], strides = [1, 1]} : vector<12x32xf32> to vector<12x8xf32>
    %49 = vector.shape_cast %40 : vector<12x8xf32> to vector<1x12x8xf32>
    %50 = vector.shape_cast %41 : vector<12x8xf32> to vector<1x12x8xf32>
    %51 = vector.shape_cast %42 : vector<12x8xf32> to vector<1x12x8xf32>
    %52 = vector.shape_cast %43 : vector<12x8xf32> to vector<1x12x8xf32>
    %53 = vector.shape_cast %45 : vector<12x8xf32> to vector<1x12x8xf32>
    %54 = vector.shape_cast %46 : vector<12x8xf32> to vector<1x12x8xf32>
    %55 = vector.shape_cast %47 : vector<12x8xf32> to vector<1x12x8xf32>
    %56 = vector.shape_cast %48 : vector<12x8xf32> to vector<1x12x8xf32>
    %57 = tpu.concatenate %49, %50, %51, %52, %53, %54, %55, %56 in 0 : vector<1x12x8xf32>, vector<1x12x8xf32>, vector<1x12x8xf32>, vector<1x12x8xf32>, vector<1x12x8xf32>, vector<1x12x8xf32>, vector<1x12x8xf32>, vector<1x12x8xf32> -> vector<8x12x8xf32>
    %58 = vector.extract_strided_slice %37 {offsets = [0, 32], sizes = [24, 32], strides = [1, 1]} : vector<24x96xf32> to vector<24x32xf32>
    %59 = vector.extract_strided_slice %58 {offsets = [0, 0], sizes = [12, 32], strides = [1, 1]} : vector<24x32xf32> to vector<12x32xf32>
    %60 = vector.extract_strided_slice %59 {offsets = [0, 0], sizes = [12, 8], strides = [1, 1]} : vector<12x32xf32> to vector<12x8xf32>
    %61 = vector.extract_strided_slice %59 {offsets = [0, 8], sizes = [12, 8], strides = [1, 1]} : vector<12x32xf32> to vector<12x8xf32>
    %62 = vector.extract_strided_slice %59 {offsets = [0, 16], sizes = [12, 8], strides = [1, 1]} : vector<12x32xf32> to vector<12x8xf32>
    %63 = vector.extract_strided_slice %59 {offsets = [0, 24], sizes = [12, 8], strides = [1, 1]} : vector<12x32xf32> to vector<12x8xf32>
    %64 = vector.extract_strided_slice %58 {offsets = [12, 0], sizes = [12, 32], strides = [1, 1]} : vector<24x32xf32> to vector<12x32xf32>
    %65 = vector.extract_strided_slice %64 {offsets = [0, 0], sizes = [12, 8], strides = [1, 1]} : vector<12x32xf32> to vector<12x8xf32>
    %66 = vector.extract_strided_slice %64 {offsets = [0, 8], sizes = [12, 8], strides = [1, 1]} : vector<12x32xf32> to vector<12x8xf32>
    %67 = vector.extract_strided_slice %64 {offsets = [0, 16], sizes = [12, 8], strides = [1, 1]} : vector<12x32xf32> to vector<12x8xf32>
    %68 = vector.extract_strided_slice %64 {offsets = [0, 24], sizes = [12, 8], strides = [1, 1]} : vector<12x32xf32> to vector<12x8xf32>
    %69 = vector.shape_cast %60 : vector<12x8xf32> to vector<1x12x8xf32>
    %70 = vector.shape_cast %61 : vector<12x8xf32> to vector<1x12x8xf32>
    %71 = vector.shape_cast %62 : vector<12x8xf32> to vector<1x12x8xf32>
    %72 = vector.shape_cast %63 : vector<12x8xf32> to vector<1x12x8xf32>
    %73 = vector.shape_cast %65 : vector<12x8xf32> to vector<1x12x8xf32>
    %74 = vector.shape_cast %66 : vector<12x8xf32> to vector<1x12x8xf32>
    %75 = vector.shape_cast %67 : vector<12x8xf32> to vector<1x12x8xf32>
    %76 = vector.shape_cast %68 : vector<12x8xf32> to vector<1x12x8xf32>
    %77 = tpu.concatenate %69, %70, %71, %72, %73, %74, %75, %76 in 0 : vector<1x12x8xf32>, vector<1x12x8xf32>, vector<1x12x8xf32>, vector<1x12x8xf32>, vector<1x12x8xf32>, vector<1x12x8xf32>, vector<1x12x8xf32>, vector<1x12x8xf32> -> vector<8x12x8xf32>
    %78 = vector.extract_strided_slice %37 {offsets = [0, 64], sizes = [24, 32], strides = [1, 1]} : vector<24x96xf32> to vector<24x32xf32>
    %79 = vector.extract_strided_slice %78 {offsets = [0, 0], sizes = [12, 32], strides = [1, 1]} : vector<24x32xf32> to vector<12x32xf32>
    %80 = vector.extract_strided_slice %79 {offsets = [0, 0], sizes = [12, 8], strides = [1, 1]} : vector<12x32xf32> to vector<12x8xf32>
    %81 = vector.extract_strided_slice %79 {offsets = [0, 8], sizes = [12, 8], strides = [1, 1]} : vector<12x32xf32> to vector<12x8xf32>
    %82 = vector.extract_strided_slice %79 {offsets = [0, 16], sizes = [12, 8], strides = [1, 1]} : vector<12x32xf32> to vector<12x8xf32>
    %83 = vector.extract_strided_slice %79 {offsets = [0, 24], sizes = [12, 8], strides = [1, 1]} : vector<12x32xf32> to vector<12x8xf32>
    %84 = vector.extract_strided_slice %78 {offsets = [12, 0], sizes = [12, 32], strides = [1, 1]} : vector<24x32xf32> to vector<12x32xf32>
    %85 = vector.extract_strided_slice %84 {offsets = [0, 0], sizes = [12, 8], strides = [1, 1]} : vector<12x32xf32> to vector<12x8xf32>
    %86 = vector.extract_strided_slice %84 {offsets = [0, 8], sizes = [12, 8], strides = [1, 1]} : vector<12x32xf32> to vector<12x8xf32>
    %87 = vector.extract_strided_slice %84 {offsets = [0, 16], sizes = [12, 8], strides = [1, 1]} : vector<12x32xf32> to vector<12x8xf32>
    %88 = vector.extract_strided_slice %84 {offsets = [0, 24], sizes = [12, 8], strides = [1, 1]} : vector<12x32xf32> to vector<12x8xf32>
    %89 = vector.shape_cast %80 : vector<12x8xf32> to vector<1x12x8xf32>
    %90 = vector.shape_cast %81 : vector<12x8xf32> to vector<1x12x8xf32>
    %91 = vector.shape_cast %82 : vector<12x8xf32> to vector<1x12x8xf32>
    %92 = vector.shape_cast %83 : vector<12x8xf32> to vector<1x12x8xf32>
    %93 = vector.shape_cast %85 : vector<12x8xf32> to vector<1x12x8xf32>
    %94 = vector.shape_cast %86 : vector<12x8xf32> to vector<1x12x8xf32>
    %95 = vector.shape_cast %87 : vector<12x8xf32> to vector<1x12x8xf32>
    %96 = vector.shape_cast %88 : vector<12x8xf32> to vector<1x12x8xf32>
    %97 = tpu.concatenate %89, %90, %91, %92, %93, %94, %95, %96 in 0 : vector<1x12x8xf32>, vector<1x12x8xf32>, vector<1x12x8xf32>, vector<1x12x8xf32>, vector<1x12x8xf32>, vector<1x12x8xf32>, vector<1x12x8xf32>, vector<1x12x8xf32> -> vector<8x12x8xf32>
    %98 = arith.truncf %57 : vector<8x12x8xf32> to vector<8x12x8xbf16>
    %99 = arith.truncf %77 : vector<8x12x8xf32> to vector<8x12x8xbf16>
    "tpu.trace_start"() <{level = 10 : i32, message = "gsd,gtd->gst"}> : () -> ()
    %cst_19 = arith.constant dense<0.000000e+00> : vector<8x12x12xf32>
    %100 = tpu.matmul %98, %99, %cst_19 {dimension_numbers = #tpu.dot_dimension_numbers<[2], [2], [1], [1], [0, 0, 0, 1, 1, 1], [0], [0]>} : vector<8x12x8xbf16>, vector<8x12x8xbf16>, vector<8x12x12xf32> -> vector<8x12x12xf32>
    "tpu.trace_stop"() : () -> ()
    %cst_20 = arith.constant 0.353553385 : f32
    %101 = vector.broadcast %cst_20 : f32 to vector<8x12x12xf32>
    %102 = arith.mulf %100, %101 : vector<8x12x12xf32>
    %103 = tpu.iota {dimensions = array<i32: 0>} : vector<12x12xi32>
    %104 = tpu.iota {dimensions = array<i32: 1>} : vector<12x12xi32>
    %105 = arith.cmpi sle, %104, %103 : vector<12x12xi32>
    %106 = vector.shape_cast %105 : vector<12x12xi1> to vector<1x12x12xi1>
    %cst_21 = arith.constant -1.000000e+09 : f32
    %107 = vector.shape_cast %106 : vector<1x12x12xi1> to vector<1x12x12xi1>
    %108 = vector.broadcast %107 : vector<1x12x12xi1> to vector<8x12x12xi1>
    %109 = vector.broadcast %cst_21 : f32 to vector<8x12x12xf32>
    %110 = arith.select %108, %102, %109 : vector<8x12x12xi1>, vector<8x12x12xf32>
    %cst_22 = arith.constant dense<0xFF800000> : vector<8x12xf32>
    %111 = vector.multi_reduction <maximumf>, %110, %cst_22 [2] : vector<8x12x12xf32> to vector<8x12xf32>
    %112 = vector.shape_cast %111 : vector<8x12xf32> to vector<8x12x1xf32>
    %113 = vector.broadcast %112 : vector<8x12x1xf32> to vector<8x12x12xf32>
    %114 = arith.subf %110, %113 : vector<8x12x12xf32>
    %115 = math.exp %114 : vector<8x12x12xf32>
    %cst_23 = arith.constant dense<0.000000e+00> : vector<8x12xf32>
    %116 = vector.multi_reduction <add>, %115, %cst_23 [2] : vector<8x12x12xf32> to vector<8x12xf32>
    %117 = vector.shape_cast %116 : vector<8x12xf32> to vector<8x12x1xf32>
    %118 = tpu.reciprocal %117 {approx = true} : vector<8x12x1xf32> -> vector<8x12x1xf32>
    %119 = vector.broadcast %118 : vector<8x12x1xf32> to vector<8x12x12xf32>
    %120 = arith.mulf %115, %119 : vector<8x12x12xf32>
    %121 = arith.truncf %120 : vector<8x12x12xf32> to vector<8x12x12xbf16>
    %122 = arith.truncf %97 : vector<8x12x8xf32> to vector<8x12x8xbf16>
    "tpu.trace_start"() <{level = 10 : i32, message = "gst,gtd->gsd"}> : () -> ()
    %cst_24 = arith.constant dense<0.000000e+00> : vector<8x12x8xf32>
    %123 = tpu.matmul %121, %122, %cst_24 {dimension_numbers = #tpu.dot_dimension_numbers<[2], [1], [1], [2], [0, 0, 0, 1, 1, 2], [0], [0]>} : vector<8x12x12xbf16>, vector<8x12x8xbf16>, vector<8x12x8xf32> -> vector<8x12x8xf32>
    "tpu.trace_stop"() : () -> ()
    %124 = vector.extract_strided_slice %123 {offsets = [0, 0, 0], sizes = [1, 12, 8], strides = [1, 1, 1]} : vector<8x12x8xf32> to vector<1x12x8xf32>
    %125 = vector.shape_cast %124 : vector<1x12x8xf32> to vector<12x8xf32>
    %126 = vector.extract_strided_slice %123 {offsets = [1, 0, 0], sizes = [1, 12, 8], strides = [1, 1, 1]} : vector<8x12x8xf32> to vector<1x12x8xf32>
    %127 = vector.shape_cast %126 : vector<1x12x8xf32> to vector<12x8xf32>
    %128 = vector.extract_strided_slice %123 {offsets = [2, 0, 0], sizes = [1, 12, 8], strides = [1, 1, 1]} : vector<8x12x8xf32> to vector<1x12x8xf32>
    %129 = vector.shape_cast %128 : vector<1x12x8xf32> to vector<12x8xf32>
    %130 = vector.extract_strided_slice %123 {offsets = [3, 0, 0], sizes = [1, 12, 8], strides = [1, 1, 1]} : vector<8x12x8xf32> to vector<1x12x8xf32>
    %131 = vector.shape_cast %130 : vector<1x12x8xf32> to vector<12x8xf32>
    %132 = tpu.concatenate %125, %127, %129, %131 in 1 : vector<12x8xf32>, vector<12x8xf32>, vector<12x8xf32>, vector<12x8xf32> -> vector<12x32xf32>
    %133 = vector.extract_strided_slice %123 {offsets = [4, 0, 0], sizes = [1, 12, 8], strides = [1, 1, 1]} : vector<8x12x8xf32> to vector<1x12x8xf32>
    %134 = vector.shape_cast %133 : vector<1x12x8xf32> to vector<12x8xf32>
    %135 = vector.extract_strided_slice %123 {offsets = [5, 0, 0], sizes = [1, 12, 8], strides = [1, 1, 1]} : vector<8x12x8xf32> to vector<1x12x8xf32>
    %136 = vector.shape_cast %135 : vector<1x12x8xf32> to vector<12x8xf32>
    %137 = vector.extract_strided_slice %123 {offsets = [6, 0, 0], sizes = [1, 12, 8], strides = [1, 1, 1]} : vector<8x12x8xf32> to vector<1x12x8xf32>
    %138 = vector.shape_cast %137 : vector<1x12x8xf32> to vector<12x8xf32>
    %139 = vector.extract_strided_slice %123 {offsets = [7, 0, 0], sizes = [1, 12, 8], strides = [1, 1, 1]} : vector<8x12x8xf32> to vector<1x12x8xf32>
    %140 = vector.shape_cast %139 : vector<1x12x8xf32> to vector<12x8xf32>
    %141 = tpu.concatenate %134, %136, %138, %140 in 1 : vector<12x8xf32>, vector<12x8xf32>, vector<12x8xf32>, vector<12x8xf32> -> vector<12x32xf32>
    %142 = tpu.concatenate %132, %141 in 0 : vector<12x32xf32>, vector<12x32xf32> -> vector<24x32xf32>
    %143 = arith.truncf %142 : vector<24x32xf32> to vector<24x32xbf16>
    %c0_25 = arith.constant 0 : index
    %c0_26 = arith.constant 0 : index
    %c0_27 = arith.constant 0 : index
    %144 = vector.load %arg15[%c0_25, %c0_26, %c0_27] : memref<1x32x32xbf16, #tpu.memory_space<vmem>>, vector<1x32x32xbf16>
    %145 = vector.shape_cast %144 : vector<1x32x32xbf16> to vector<32x32xbf16>
    %cst_28 = arith.constant dense<0.000000e+00> : vector<24x32xf32>
    %146 = tpu.matmul %143, %145, %cst_28 {dimension_numbers = #tpu.dot_dimension_numbers<[1], [0], [0], [1], [0, 0, 1, 1], [], []>} : vector<24x32xbf16>, vector<32x32xbf16>, vector<24x32xf32> -> vector<24x32xf32>
    %c0_29 = arith.constant 0 : index
    %c0_30 = arith.constant 0 : index
    %c0_31 = arith.constant 0 : index
    %147 = vector.load %arg16[%c0_29, %c0_30, %c0_31] : memref<1x1x32xf32, #tpu.memory_space<vmem>>, vector<1x1x32xf32>
    %148 = vector.shape_cast %147 : vector<1x1x32xf32> to vector<1x32xf32>
    %149 = vector.broadcast %148 : vector<1x32xf32> to vector<24x32xf32>
    %150 = arith.addf %146, %149 : vector<24x32xf32>
    %151 = arith.addf %3, %150 : vector<24x32xf32>
    %c0_32 = arith.constant 0 : index
    %c0_33 = arith.constant 0 : index
    %c0_34 = arith.constant 0 : index
    %152 = vector.load %arg17[%c0_32, %c0_33, %c0_34] : memref<1x1x32xf32, #tpu.memory_space<vmem>>, vector<1x1x32xf32>
    %153 = vector.shape_cast %152 : vector<1x1x32xf32> to vector<1x32xf32>
    %c0_35 = arith.constant 0 : index
    %c0_36 = arith.constant 0 : index
    %c0_37 = arith.constant 0 : index
    %154 = vector.load %arg18[%c0_35, %c0_36, %c0_37] : memref<1x1x32xf32, #tpu.memory_space<vmem>>, vector<1x1x32xf32>
    %155 = vector.shape_cast %154 : vector<1x1x32xf32> to vector<1x32xf32>
    %cst_38 = arith.constant dense<0.000000e+00> : vector<24xf32>
    %156 = vector.multi_reduction <add>, %151, %cst_38 [1] : vector<24x32xf32> to vector<24xf32>
    %157 = vector.shape_cast %156 : vector<24xf32> to vector<24x1xf32>
    %cst_39 = arith.constant 3.200000e+01 : f32
    %158 = vector.broadcast %cst_39 : f32 to vector<24x1xf32>
    %159 = arith.divf %157, %158 : vector<24x1xf32>
    %160 = vector.broadcast %159 : vector<24x1xf32> to vector<24x32xf32>
    %161 = arith.subf %151, %160 : vector<24x32xf32>
    %162 = arith.mulf %161, %161 : vector<24x32xf32>
    %cst_40 = arith.constant dense<0.000000e+00> : vector<24xf32>
    %163 = vector.multi_reduction <add>, %162, %cst_40 [1] : vector<24x32xf32> to vector<24xf32>
    %164 = vector.shape_cast %163 : vector<24xf32> to vector<24x1xf32>
    %cst_41 = arith.constant 3.200000e+01 : f32
    %165 = vector.broadcast %cst_41 : f32 to vector<24x1xf32>
    %166 = arith.divf %164, %165 : vector<24x1xf32>
    %167 = vector.broadcast %159 : vector<24x1xf32> to vector<24x32xf32>
    %168 = arith.subf %151, %167 : vector<24x32xf32>
    %cst_42 = arith.constant 9.99999974E-6 : f32
    %169 = vector.broadcast %cst_42 : f32 to vector<24x1xf32>
    %170 = arith.addf %166, %169 : vector<24x1xf32>
    %171 = math.rsqrt %170 : vector<24x1xf32>
    %172 = vector.broadcast %171 : vector<24x1xf32> to vector<24x32xf32>
    %173 = arith.mulf %168, %172 : vector<24x32xf32>
    %174 = vector.broadcast %153 : vector<1x32xf32> to vector<24x32xf32>
    %175 = arith.mulf %173, %174 : vector<24x32xf32>
    %176 = vector.broadcast %155 : vector<1x32xf32> to vector<24x32xf32>
    %177 = arith.addf %175, %176 : vector<24x32xf32>
    %178 = arith.truncf %177 : vector<24x32xf32> to vector<24x32xbf16>
    %c0_43 = arith.constant 0 : index
    %c0_44 = arith.constant 0 : index
    %c0_45 = arith.constant 0 : index
    %179 = vector.load %arg19[%c0_43, %c0_44, %c0_45] : memref<1x32x128xbf16, #tpu.memory_space<vmem>>, vector<1x32x128xbf16>
    %180 = vector.shape_cast %179 : vector<1x32x128xbf16> to vector<32x128xbf16>
    %cst_46 = arith.constant dense<0.000000e+00> : vector<24x128xf32>
    %181 = tpu.matmul %178, %180, %cst_46 {dimension_numbers = #tpu.dot_dimension_numbers<[1], [0], [0], [1], [0, 0, 1, 1], [], []>} : vector<24x32xbf16>, vector<32x128xbf16>, vector<24x128xf32> -> vector<24x128xf32>
    %c0_47 = arith.constant 0 : index
    %c0_48 = arith.constant 0 : index
    %c0_49 = arith.constant 0 : index
    %182 = vector.load %arg20[%c0_47, %c0_48, %c0_49] : memref<1x1x128xf32, #tpu.memory_space<vmem>>, vector<1x1x128xf32>
    %183 = vector.shape_cast %182 : vector<1x1x128xf32> to vector<1x128xf32>
    %184 = vector.broadcast %183 : vector<1x128xf32> to vector<24x128xf32>
    %185 = arith.addf %181, %184 : vector<24x128xf32>
    %cst_50 = arith.constant 5.000000e-01 : f32
    %186 = vector.broadcast %cst_50 : f32 to vector<24x128xf32>
    %187 = arith.mulf %186, %185 : vector<24x128xf32>
    %cst_51 = arith.constant 4.471500e-02 : f32
    %188 = vector.broadcast %cst_51 : f32 to vector<24x128xf32>
    %189 = arith.mulf %188, %185 : vector<24x128xf32>
    %190 = arith.mulf %189, %185 : vector<24x128xf32>
    %191 = arith.mulf %190, %185 : vector<24x128xf32>
    %192 = arith.addf %185, %191 : vector<24x128xf32>
    %cst_52 = arith.constant 0.797884583 : f32
    %193 = vector.broadcast %cst_52 : f32 to vector<24x128xf32>
    %194 = arith.mulf %193, %192 : vector<24x128xf32>
    %195 = math.tanh %194 : vector<24x128xf32>
    %cst_53 = arith.constant 1.000000e+00 : f32
    %196 = vector.broadcast %cst_53 : f32 to vector<24x128xf32>
    %197 = arith.addf %196, %195 : vector<24x128xf32>
    %198 = arith.mulf %187, %197 : vector<24x128xf32>
    %199 = arith.truncf %198 : vector<24x128xf32> to vector<24x128xbf16>
    %c0_54 = arith.constant 0 : index
    %c0_55 = arith.constant 0 : index
    %c0_56 = arith.constant 0 : index
    %200 = vector.load %arg21[%c0_54, %c0_55, %c0_56] : memref<1x128x32xbf16, #tpu.memory_space<vmem>>, vector<1x128x32xbf16>
    %201 = vector.shape_cast %200 : vector<1x128x32xbf16> to vector<128x32xbf16>
    %cst_57 = arith.constant dense<0.000000e+00> : vector<24x32xf32>
    %202 = tpu.matmul %199, %201, %cst_57 {dimension_numbers = #tpu.dot_dimension_numbers<[1], [0], [0], [1], [0, 0, 1, 1], [], []>} : vector<24x128xbf16>, vector<128x32xbf16>, vector<24x32xf32> -> vector<24x32xf32>
    %c0_58 = arith.constant 0 : index
    %c0_59 = arith.constant 0 : index
    %c0_60 = arith.constant 0 : index
    %203 = vector.load %arg22[%c0_58, %c0_59, %c0_60] : memref<1x1x32xf32, #tpu.memory_space<vmem>>, vector<1x1x32xf32>
    %204 = vector.shape_cast %203 : vector<1x1x32xf32> to vector<1x32xf32>
    %205 = vector.broadcast %204 : vector<1x32xf32> to vector<24x32xf32>
    %206 = arith.addf %202, %205 : vector<24x32xf32>
    %207 = arith.addf %151, %206 : vector<24x32xf32>
    %c0_61 = arith.constant 0 : index
    %c0_62 = arith.constant 0 : index
    %208 = vector.load %arg26[%c0_61, %c0_62] : memref<24x32xf32, #tpu.memory_space<vmem>>, vector<24x32xf32>
    tpu.vector_store %arg26[%c0_61, %c0_62], %207 {strides = array<i32>} : memref<24x32xf32, #tpu.memory_space<vmem>>, vector<24x32xf32>,
    %c1_i32 = arith.constant 1 : i32
    %209 = arith.cmpi eq, %arg0, %c1_i32 : i32
    %210 = arith.extui %209 : i1 to i32
    %c0_i32_63 = arith.constant 0 : i32
    %211 = arith.cmpi ne, %210, %c0_i32_63 : i32
    scf.if %211 {
      %c0_64 = arith.constant 0 : index
      %c0_65 = arith.constant 0 : index
      %212 = vector.load %arg23[%c0_64, %c0_65] : memref<1x32xf32, #tpu.memory_space<vmem>>, vector<1x32xf32>
      %c0_66 = arith.constant 0 : index
      %c0_67 = arith.constant 0 : index
      %213 = vector.load %arg24[%c0_66, %c0_67] : memref<1x32xf32, #tpu.memory_space<vmem>>, vector<1x32xf32>
      %cst_68 = arith.constant dense<0.000000e+00> : vector<24xf32>
      %214 = vector.multi_reduction <add>, %207, %cst_68 [1] : vector<24x32xf32> to vector<24xf32>
      %215 = vector.shape_cast %214 : vector<24xf32> to vector<24x1xf32>
      %cst_69 = arith.constant 3.200000e+01 : f32
      %216 = vector.broadcast %cst_69 : f32 to vector<24x1xf32>
      %217 = arith.divf %215, %216 : vector<24x1xf32>
      %218 = vector.broadcast %217 : vector<24x1xf32> to vector<24x32xf32>
      %219 = arith.subf %207, %218 : vector<24x32xf32>
      %220 = arith.mulf %219, %219 : vector<24x32xf32>
      %cst_70 = arith.constant dense<0.000000e+00> : vector<24xf32>
      %221 = vector.multi_reduction <add>, %220, %cst_70 [1] : vector<24x32xf32> to vector<24xf32>
      %222 = vector.shape_cast %221 : vector<24xf32> to vector<24x1xf32>
      %cst_71 = arith.constant 3.200000e+01 : f32
      %223 = vector.broadcast %cst_71 : f32 to vector<24x1xf32>
      %224 = arith.divf %222, %223 : vector<24x1xf32>
      %225 = vector.broadcast %217 : vector<24x1xf32> to vector<24x32xf32>
      %226 = arith.subf %207, %225 : vector<24x32xf32>
      %cst_72 = arith.constant 9.99999974E-6 : f32
      %227 = vector.broadcast %cst_72 : f32 to vector<24x1xf32>
      %228 = arith.addf %224, %227 : vector<24x1xf32>
      %229 = math.rsqrt %228 : vector<24x1xf32>
      %230 = vector.broadcast %229 : vector<24x1xf32> to vector<24x32xf32>
      %231 = arith.mulf %226, %230 : vector<24x32xf32>
      %232 = vector.broadcast %212 : vector<1x32xf32> to vector<24x32xf32>
      %233 = arith.mulf %231, %232 : vector<24x32xf32>
      %234 = vector.broadcast %213 : vector<1x32xf32> to vector<24x32xf32>
      %235 = arith.addf %233, %234 : vector<24x32xf32>
      %236 = arith.truncf %235 : vector<24x32xf32> to vector<24x32xbf16>
      %c0_73 = arith.constant 0 : index
      %c0_74 = arith.constant 0 : index
      %237 = vector.load %arg3[%c0_73, %c0_74] : memref<128x32xbf16, #tpu.memory_space<vmem>>, vector<128x32xbf16>
      %cst_75 = arith.constant dense<0.000000e+00> : vector<24x128xf32>
      %238 = tpu.matmul %236, %237, %cst_75 {dimension_numbers = #tpu.dot_dimension_numbers<[1], [1], [0], [0], [0, 0, 1, 0], [], []>} : vector<24x32xbf16>, vector<128x32xbf16>, vector<24x128xf32> -> vector<24x128xf32>
      %239 = vector.extract_strided_slice %238 {offsets = [0, 0], sizes = [12, 128], strides = [1, 1]} : vector<24x128xf32> to vector<12x128xf32>
      %c0_76 = arith.constant 0 : index
      %c0_77 = arith.constant 0 : index
      %c0_78 = arith.constant 0 : index
      %240 = vector.load %arg25[%c0_76, %c0_77, %c0_78] : memref<2x12x128xf32, #tpu.memory_space<vmem>>, vector<1x12x128xf32>
      %241 = vector.shape_cast %240 : vector<1x12x128xf32> to vector<12x128xf32>
      %242 = vector.shape_cast %239 : vector<12x128xf32> to vector<1x12x128xf32>
      tpu.vector_store %arg25[%c0_76, %c0_77, %c0_78], %242 {strides = array<i32>} : memref<2x12x128xf32, #tpu.memory_space<vmem>>, vector<1x12x128xf32>,
      %243 = vector.extract_strided_slice %238 {offsets = [12, 0], sizes = [12, 128], strides = [1, 1]} : vector<24x128xf32> to vector<12x128xf32>
      %c1 = arith.constant 1 : index
      %c0_79 = arith.constant 0 : index
      %c0_80 = arith.constant 0 : index
      %244 = vector.load %arg25[%c1, %c0_79, %c0_80] : memref<2x12x128xf32, #tpu.memory_space<vmem>>, vector<1x12x128xf32>
      %245 = vector.shape_cast %244 : vector<1x12x128xf32> to vector<12x128xf32>
      %246 = vector.shape_cast %243 : vector<12x128xf32> to vector<1x12x128xf32>
      tpu.vector_store %arg25[%c1, %c0_79, %c0_80], %246 {strides = array<i32>} : memref<2x12x128xf32, #tpu.memory_space<vmem>>, vector<1x12x128xf32>,
    } else {
    }
    return
  }
  func.func @transform_0(%arg0: i32) -> (i32, i32) {
    %c0_i32 = arith.constant 0 : i32
    %c0_i32_0 = arith.constant 0 : i32
    %c0_i32_1 = arith.constant 0 : i32
    return %c0_i32, %c0_i32_0 : i32, i32
  }
  func.func @transform_1(%arg0: i32) -> (i32, i32) {
    %c0_i32 = arith.constant 0 : i32
    %c0_i32_0 = arith.constant 0 : i32
    %c0_i32_1 = arith.constant 0 : i32
    return %c0_i32, %c0_i32_0 : i32, i32
  }
  func.func @transform_2(%arg0: i32) -> (i32, i32) {
    %c0_i32 = arith.constant 0 : i32
    %c0_i32_0 = arith.constant 0 : i32
    %c0_i32_1 = arith.constant 0 : i32
    return %c0_i32, %c0_i32_0 : i32, i32
  }
  func.func @transform_3(%arg0: i32) -> (i32, i32) {
    %c0_i32 = arith.constant 0 : i32
    %c0_i32_0 = arith.constant 0 : i32
    %c0_i32_1 = arith.constant 0 : i32
    return %c0_i32, %c0_i32_0 : i32, i32
  }
  func.func @transform_4(%arg0: i32) -> (i32, i32) {
    %c0_i32 = arith.constant 0 : i32
    %c0_i32_0 = arith.constant 0 : i32
    %c0_i32_1 = arith.constant 0 : i32
    return %c0_i32, %c0_i32_0 : i32, i32
  }
  func.func @transform_5(%arg0: i32) -> (i32, i32) {
    %c0_i32 = arith.constant 0 : i32
    %c0_i32_0 = arith.constant 0 : i32
    %c0_i32_1 = arith.constant 0 : i32
    return %c0_i32, %c0_i32_0 : i32, i32
  }
  func.func @transform_6(%arg0: i32) -> (i32, i32) {
    %c0_i32 = arith.constant 0 : i32
    %c0_i32_0 = arith.constant 0 : i32
    %c0_i32_1 = arith.constant 0 : i32
    return %c0_i32, %c0_i32_0 : i32, i32
  }
  func.func @transform_7(%arg0: i32) -> (i32, i32) {
    %c0_i32 = arith.constant 0 : i32
    %c0_i32_0 = arith.constant 0 : i32
    %c0_i32_1 = arith.constant 0 : i32
    return %c0_i32, %c0_i32_0 : i32, i32
  }
  func.func @transform_8(%arg0: i32) -> (i32, i32) {
    %c0_i32 = arith.constant 0 : i32
    %c0_i32_0 = arith.constant 0 : i32
    %c0_i32_1 = arith.constant 0 : i32
    return %c0_i32, %c0_i32_0 : i32, i32
  }
  func.func @transform_9(%arg0: i32) -> (i32, i32) {
    %c0_i32 = arith.constant 0 : i32
    %c0_i32_0 = arith.constant 0 : i32
    %c0_i32_1 = arith.constant 0 : i32
    return %c0_i32, %c0_i32_0 : i32, i32
  }
  func.func @transform_10(%arg0: i32) -> (i32, i32, i32) {
    %c0_i32 = arith.constant 0 : i32
    %c0_i32_0 = arith.constant 0 : i32
    %c0_i32_1 = arith.constant 0 : i32
    return %arg0, %c0_i32, %c0_i32_0 : i32, i32, i32
  }
  func.func @transform_11(%arg0: i32) -> (i32, i32, i32) {
    %c0_i32 = arith.constant 0 : i32
    %c0_i32_0 = arith.constant 0 : i32
    %c0_i32_1 = arith.constant 0 : i32
    return %arg0, %c0_i32, %c0_i32_0 : i32, i32, i32
  }
  func.func @transform_12(%arg0: i32) -> (i32, i32, i32) {
    %c0_i32 = arith.constant 0 : i32
    %c0_i32_0 = arith.constant 0 : i32
    %c0_i32_1 = arith.constant 0 : i32
    return %arg0, %c0_i32, %c0_i32_0 : i32, i32, i32
  }
  func.func @transform_13(%arg0: i32) -> (i32, i32, i32) {
    %c0_i32 = arith.constant 0 : i32
    %c0_i32_0 = arith.constant 0 : i32
    %c0_i32_1 = arith.constant 0 : i32
    return %arg0, %c0_i32, %c0_i32_0 : i32, i32, i32
  }
  func.func @transform_14(%arg0: i32) -> (i32, i32, i32) {
    %c0_i32 = arith.constant 0 : i32
    %c0_i32_0 = arith.constant 0 : i32
    %c0_i32_1 = arith.constant 0 : i32
    return %arg0, %c0_i32, %c0_i32_0 : i32, i32, i32
  }
  func.func @transform_15(%arg0: i32) -> (i32, i32, i32) {
    %c0_i32 = arith.constant 0 : i32
    %c0_i32_0 = arith.constant 0 : i32
    %c0_i32_1 = arith.constant 0 : i32
    return %arg0, %c0_i32, %c0_i32_0 : i32, i32, i32
  }
  func.func @transform_16(%arg0: i32) -> (i32, i32, i32) {
    %c0_i32 = arith.constant 0 : i32
    %c0_i32_0 = arith.constant 0 : i32
    %c0_i32_1 = arith.constant 0 : i32
    return %arg0, %c0_i32, %c0_i32_0 : i32, i32, i32
  }
  func.func @transform_17(%arg0: i32) -> (i32, i32, i32) {
    %c0_i32 = arith.constant 0 : i32
    %c0_i32_0 = arith.constant 0 : i32
    %c0_i32_1 = arith.constant 0 : i32
    return %arg0, %c0_i32, %c0_i32_0 : i32, i32, i32
  }
  func.func @transform_18(%arg0: i32) -> (i32, i32, i32) {
    %c0_i32 = arith.constant 0 : i32
    %c0_i32_0 = arith.constant 0 : i32
    %c0_i32_1 = arith.constant 0 : i32
    return %arg0, %c0_i32, %c0_i32_0 : i32, i32, i32
  }
  func.func @transform_19(%arg0: i32) -> (i32, i32, i32) {
    %c0_i32 = arith.constant 0 : i32
    %c0_i32_0 = arith.constant 0 : i32
    %c0_i32_1 = arith.constant 0 : i32
    return %arg0, %c0_i32, %c0_i32_0 : i32, i32, i32
  }
  func.func @transform_20(%arg0: i32) -> (i32, i32, i32) {
    %c0_i32 = arith.constant 0 : i32
    %c0_i32_0 = arith.constant 0 : i32
    %c0_i32_1 = arith.constant 0 : i32
    return %arg0, %c0_i32, %c0_i32_0 : i32, i32, i32
  }
  func.func @transform_21(%arg0: i32) -> (i32, i32, i32) {
    %c0_i32 = arith.constant 0 : i32
    %c0_i32_0 = arith.constant 0 : i32
    %c0_i32_1 = arith.constant 0 : i32
    return %arg0, %c0_i32, %c0_i32_0 : i32, i32, i32
  }
  func.func @transform_22(%arg0: i32) -> (i32, i32) {
    %c0_i32 = arith.constant 0 : i32
    %c0_i32_0 = arith.constant 0 : i32
    %c0_i32_1 = arith.constant 0 : i32
    return %c0_i32, %c0_i32_0 : i32, i32
  }
  func.func @transform_23(%arg0: i32) -> (i32, i32) {
    %c0_i32 = arith.constant 0 : i32
    %c0_i32_0 = arith.constant 0 : i32
    %c0_i32_1 = arith.constant 0 : i32
    return %c0_i32, %c0_i32_0 : i32, i32
  }
  func.func @transform_24(%arg0: i32) -> (i32, i32, i32) {
    %c0_i32 = arith.constant 0 : i32
    %c0_i32_0 = arith.constant 0 : i32
    %c0_i32_1 = arith.constant 0 : i32
    %c0_i32_2 = arith.constant 0 : i32
    return %c0_i32, %c0_i32_0, %c0_i32_1 : i32, i32, i32
  }
}

</mosaic_0001>

<bundles_post_ra>
// kernel: clip_caption_forward.1
= control target key start
LH: loop header
LB: loop body
LE: loop exit
PB: predicated region body
PF: predicated region fallthrough
CT: control target
= control target key end

     0   :  { %s4792_s0 = inlined_call_operand.vmem [shape: s32[16,1], index: 0, kind: input, shape index: {}]   ;;  %s4793_s1 = inlined_call_operand.vmem [shape: f32[2,64], index: 1, kind: input, shape index: {}]   ;;  %s4794_s2 = inlined_call_operand.vmem [shape: bf16[128,32], index: 2, kind: input, shape index: {}]   ;;  %s4795_s3 = inlined_call_operand.vmem [shape: f32[16,32], index: 3, kind: input, shape index: {}]   ;;  %s4796_s4 = inlined_call_operand.vmem [shape: bf16[64,32], index: 4, kind: input, shape index: {}]   ;;  %s4797_s5 = inlined_call_operand.vmem [shape: f32[1,32], index: 5, kind: input, shape index: {}]   ;;  %s4798_s6 = inlined_call_operand.vmem [shape: bf16[32,64], index: 6, kind: input, shape index: {}]   ;;  %s4799_s7 = inlined_call_operand.vmem [shape: f32[1,64], index: 7, kind: input, shape index: {}]   ;;  %s4800_s8 = inlined_call_operand.vmem [shape: bf16[64,128], index: 8, kind: input, shape index: {}]   ;;  %s4801_s9 = inlined_call_operand.vmem [shape: f32[1,128], index: 9, kind: input, shape index: {}]   ;;  %s4802_s10 = inlined_call_operand.vmem [shape: f32[2,1,32], index: 10, kind: input, shape index: {}]   ;;  %s4803_s11 = inlined_call_operand.vmem [shape: f32[2,1,32], index: 11, kind: input, shape index: {}]   ;;  %s4804_s12 = inlined_call_operand.vmem [shape: bf16[2,32,96], index: 12, kind: input, shape index: {}]   ;;  %s4805_s13 = inlined_call_operand.vmem [shape: f32[2,1,96], index: 13, kind: input, shape index: {}]   ;;  %s4806_s14 = inlined_call_operand.vmem [shape: bf16[2,32,32], index: 14, kind: input, shape index: {}]   ;;  %s4807_s15 = inlined_call_operand.vmem [shape: f32[2,1,32], index: 15, kind: input, shape index: {}]   ;;  %s4808_s16 = inlined_call_operand.vmem [shape: f32[2,1,32], index: 16, kind: input, shape index: {}]   ;;  %s4809_s17 = inlined_call_operand.vmem [shape: f32[2,1,32], index: 17, kind: input, shape index: {}]   ;;  %s4810_s18 = inlined_call_operand.vmem [shape: bf16[2,32,128], index: 18, kind: input, shape index: {}]   ;;  %s4811_s19 = inlined_call_operand.vmem [shape: f32[2,1,128], index: 19, kind: input, shape index: {}]   ;;  %s4812_s20 = inlined_call_operand.vmem [shape: bf16[2,128,32], index: 20, kind: input, shape index: {}]   ;;  %s4813_s21 = inlined_call_operand.vmem [shape: f32[2,1,32], index: 21, kind: input, shape index: {}]   ;;  %s4814_s22 = inlined_call_operand.vmem [shape: f32[1,32], index: 22, kind: input, shape index: {}]   ;;  %s4815_s23 = inlined_call_operand.vmem [shape: f32[1,32], index: 23, kind: input, shape index: {}]   ;;  %s4816_s24 = inlined_call_operand.vmem [shape: f32[2,12,128], index: 24, kind: output, shape index: {}]  }
   0x1   :  { %4827 = sst [smem:[#allocation5_spill]] %s4792_s0 }
   0x2   :  { %4828 = sst [smem:[#allocation6_spill]] %s4793_s1 }
   0x3   :  { %4829 = sst [smem:[#allocation7_spill]] %s4794_s2 }
   0x4   :  { %4830 = sst [smem:[#allocation8_spill]] %s4795_s3 }
   0x5   :  { %4831 = sst [smem:[#allocation9_spill]] %s4796_s4 }
   0x6   :  { %4832 = sst [smem:[#allocation10_spill]] %s4797_s5  ;;  %s4094_s5 = smov 0  }
   0x7   :  { %4833 = sst [smem:[#allocation11_spill]] %s4798_s6 }
   0x8   :  { %4834 = sst [smem:[#allocation12_spill]] %s4799_s7 }
   0x9   :  { %4835 = sst [smem:[#allocation13_spill]] %s4800_s8 }
   0xa   :  { %4836 = sst [smem:[#allocation14_spill]] %s4804_s12 }
   0xb   :  { %4837 = sst [smem:[#allocation15_spill]] %s4806_s14 }
   0xc   :  { %4838 = sst [smem:[#allocation16_spill]] %s4814_s22 }
   0xd   :  { %4839 = sst [smem:[#allocation17_spill]] %s4815_s23 }
   0xe   :  { %4840 = sst [smem:[#allocation18_spill]] %s4816_s24 }
   0xf LB: > { %4841 = sst [smem:[#allocation3_spill]] %s3950_s5  ;;  %s4100_s26 = sadd.s32 4294967295, %s3950_s5   ;;  %s3950_s5 = sphi %s4094_s5, %s34_s5  }
  0x10   : > { %p3316_p0 = scmp.ge.s32.totalorder %s3950_s5, 1  ;;  %p751_p1 = scmp.lt.s32.totalorder %s3950_s5, 3 }
  0x12   : > { %p752_p2 = pnand %p3316_p0, %p751_p1 }
  0x14   : > { %755 = sbr.rel (%p752_p2) target bundleno = 3936 (0xf60), region = 116 }
  0x19   : > { %p851_p3 = scmp.lt.s32.totalorder %s4100_s26, 1  ;;  %s4842_s12 = sld [smem:[#allocation14_spill]] }
  0x1a   : > { %s4843_s14 = sld [smem:[#allocation15_spill]]  ;;  %p3325_p4 = scmp.ne.s32.totalorder %s4100_s26, 0 }
  0x1b   : > { %s4106_s27 = scalar_select %p851_p3, %s4100_s26, 1 }
  0x1c   : > { %s4845_s4 = sld [smem:[#allocation9_spill]] (!%p3325_p4)  ;;  %s3956_s2 = smov (!%p3325_p4), 96  }
  0x1d   : > { %s3415_s30 = sshll.u32 %s4106_s27, 4  ;;  %s875_s22 = scalar_lea.vmem %s4808_s16, %s4106_s27 }
  0x1e   : > { %s878_s8 = scalar_lea.vmem %s4809_s17, %s4106_s27  ;;  %899 = sbr.rel (%p3325_p4) target bundleno = 786 (0x312), region = 120 }
  0x1f   : > { %s4124_s28 = scalar_lea.vmem %s4842_s12, %s3415_s30  ;;  %s4146_s12 = scalar_lea.vmem %s4810_s18, %s3415_s30 }
  0x20   : > { %s4129_s24 = scalar_lea.vmem %s4843_s14, %s3415_s30  ;;  %s4846_s25 = sld [smem:[#allocation6_spill]] (!%p3325_p4) }
  0x21   : > { %4844 = sst [smem:[#allocation4_spill]] %s4129_s24  ;;  %s3418_s24 = sshll.u32 %s4106_s27, 6 }
  0x22   : > { %s4156_s29 = scalar_lea.vmem %s4812_s20, %s3418_s24  ;;  %s4847_s24 = sld [smem:[#allocation11_spill]] (!%p3325_p4) }
  0x23   : > { %v3751_v0 = vld [vmem:[%s4845_s4 + $0x18] sm:$0xff]   ;;  %v3952_v1 = vmov 0.0   ;;  %v3752_v2 = vld [vmem:[%s4845_s4 + $0x10] sm:$0xff]   ;;  %vm3953_vm0 = vmmov 0   ;;  %v3753_v3 = vld [vmem:[%s4845_s4 + $0x8] sm:$0xff]   ;;  %vm1063_vm1 = vcmask 523264   ;;  %v902_v31 = vlaneseq }
  0x24   : > { %3525 = vmatprep.subr.bf16.mxu1 %v3952_v1  ;;  %3505 = vmatprep.subr.bf16.mxu0 %v3952_v1  ;;  %v3754_v4 = vld [vmem:[%s4845_s4] sm:$0xff]   ;;  %s4848_s7 = sld [smem:[#allocation10_spill]]  ;;  %vm1131_vm2 = vcmask 261120   ;;  %v3954_v17 = vmov 0   ;;  %v3955_v41 = vmov 1.0|1.0  }
  0x25   : > { %3526 = vmatpush3.bf16.msra.mxu1 %v3751_v0  ;;  %3533 = vmatprep.mubr.msk.bf16.mxu1 %vm3953_vm0, %v3952_v1  ;;  %s4849_s30 = sld [smem:[#allocation13_spill]]  ;;  %v903_v33 = vand.u32 127, %v902_v31  ;;  %vm1285_vm6 = vcmask 1043456   ;;  %v3348_v55 = vld [vmem:[%s4801_s9] ss:$0 sm:$0xff]  ;;  %vm1276_vm7 = vcmask 1041408  }
  0x26   : > { %3527 = vmatprep.subr.bf16.mxu1 %v3952_v1  ;;  %3521 = vmatprep.mubr.msk.bf16.mxu0 %vm3953_vm0, %v3952_v1  ;;  %v1022_v5 = vld [vmem:[%s4846_s25] sm:$0x3]  ;;  %s4850_s6 = sld [smem:[#allocation5_spill]]  ;;  %vm1274_vm8 = vcmask 1040384   ;;  %vm1278_vm9 = vcmask 1042432   ;;  %vm1281_vm10 = vcmask 257024  }
  0x27   : > { %v1023_v6 = vpack.c.bf16 %v1022_v5, %v1022_v5  ;;  %3750 = vset.pattern.permute.xlu0 %v3954_v17  ;;  %s4851_s14 = sld [smem:[#allocation7_spill]] }
  0x28   : > { %v3755_v7 = vld [vmem:[%s4847_s24 + $0x8] sm:$0xff]   ;;  %v3756_v8 = vld [vmem:[%s4847_s24] sm:$0xff]   ;;  %s4852_s3 = sld [smem:[#allocation12_spill]] }
  0x29   : > { %3528 = vmatpush3.bf16.msra.mxu1 %v3752_v2  ;;  %s4853_s0 = sld [smem:[#allocation8_spill]] }
  0x2a   : > { %3529 = vmatprep.subr.bf16.mxu1 %v3952_v1  ;;  %v3338_v9 = vld [vmem:[%s4848_s7] ss:$0 sm:$0xff] }
  0x2b   : > { %v3757_v16 = vld [vmem:[%s4849_s30 + $0x18] sm:$0xff]   ;;  %v3758_v19 = vld [vmem:[%s4849_s30 + $0x10] sm:$0xff]   ;;  %v3759_v21 = vld [vmem:[%s4849_s30 + $0x8] sm:$0xff]  }
  0x2c   : > { %v900_v18 = vld [vmem:[%s4850_s6] sm:$0xff]  ;;  %v901_v20 = vld [vmem:[%s4850_s6 + $0x8] sm:$0xff] }
  0x2d   : > { %3530 = vmatpush3.bf16.msra.mxu1 %v3753_v3  ;;  %905 = vperm.xlu0 %3750, %v900_v18   ;;  %v3760_v22 = vld [vmem:[%s4849_s30] sm:$0xff]   ;;  %v3761_v23 = vld [vmem:[%s4851_s14 + $0x38] sm:$0xff]   ;;  %v3762_v24 = vld [vmem:[%s4851_s14 + $0x30] sm:$0xff]  }
  0x2e   : > { %3531 = vmatprep.subr.bf16.mxu1 %v3952_v1  ;;  %3506 = vmatpush3.bf16.msra.mxu0 %v3761_v23  ;;  %v3763_v25 = vld [vmem:[%s4851_s14 + $0x28] sm:$0xff]   ;;  %v3764_v26 = vld [vmem:[%s4851_s14 + $0x20] sm:$0xff]   ;;  %v3765_v27 = vld [vmem:[%s4851_s14 + $0x18] sm:$0xff]  }
  0x2f   : > { %3507 = vmatprep.subr.bf16.mxu0 %v3952_v1  ;;  %v3766_v28 = vld [vmem:[%s4851_s14 + $0x10] sm:$0xff]   ;;  %v3767_v29 = vld [vmem:[%s4851_s14 + $0x8] sm:$0xff]   ;;  %v3768_v30 = vld [vmem:[%s4851_s14] sm:$0xff]   ;;  %s3958_s14 = smov 32  }
  0x30   : > { %v3344_v32 = vld [vmem:[%s4852_s3] ss:$0 sm:$0xff]  ;;  %v1260_v45 = vld [vmem:[%s4853_s0 + $0x8] sm:$0xf]  ;;  %s3957_s3 = smov 64  }
  0x31   : > { %3532 = vmatpush3.bf16.msra.mxu1 %v3754_v4  ;;  %908 = vperm.xlu0 %3750, %v901_v20   ;;  %v1259_v44 = vld [vmem:[%s4853_s0] sm:$0xff]  ;;  %v1287_v47 = vrot.slane %v1260_v45, 4 }
  0x32   : > { %3537 = vmatprep.subr.bf16.mxu1 %v3952_v1  ;;  %3508 = vmatpush3.bf16.msra.mxu0 %v3762_v24  ;;  %v1286_v46 = vrot.slane %v1259_v44, 4 }
  0x33   : > { %3509 = vmatprep.subr.bf16.mxu0 %v3952_v1 }
  0x34   : > { %3534 = vmatmul.mubr.msk.bf16.vlgmr.msra.gmra.mxu1 %vm1063_vm1, %v1023_v6  ;;  %v1288_v48 = vsel %vm1285_vm6, %v1286_v46, %v1287_v47 }
  0x35   : > { %3538 = vmatpush3.bf16.msra.mxu1 %v3755_v7  ;;  %3541 = vmatprep.mubr.msk.bf16.mxu1 %vm3953_vm0, %v3952_v1 }
  0x36   : > { %3539 = vmatprep.subr.bf16.mxu1 %v3952_v1  ;;  %3510 = vmatpush3.bf16.msra.mxu0 %v3763_v25 }
  0x37   : > { %3511 = vmatprep.subr.bf16.mxu0 %v3952_v1 }
  0x39   : > { %3540 = vmatpush3.bf16.msra.mxu1 %v3756_v8 }
  0x3a   : > { %3545 = vmatprep.subr.bf16.mxu1 %v3952_v1  ;;  %3512 = vmatpush3.bf16.msra.mxu0 %v3764_v26 }
  0x3b   : > { %3513 = vmatprep.subr.bf16.mxu0 %v3952_v1 }
  0x3e   : > { %3514 = vmatpush3.bf16.msra.mxu0 %v3765_v27 }
  0x3f   : > { %3515 = vmatprep.subr.bf16.mxu0 %v3952_v1 }
  0x42   : > { %3516 = vmatpush3.bf16.msra.mxu0 %v3766_v28 }
  0x43   : > { %3517 = vmatprep.subr.bf16.mxu0 %v3952_v1 }
  0x46   : > { %3518 = vmatpush3.bf16.msra.mxu0 %v3767_v29 }
  0x47   : > { %3519 = vmatprep.subr.bf16.mxu0 %v3952_v1 }
  0x4a   : > { %3520 = vmatpush3.bf16.msra.mxu0 %v3768_v30 }
  0xa8   : > { %v906_v35 = vpop.permute.xlu0 %905 }
  0xa9   : > { %vm910_vm3 = vcmp.eq.s32.totalorder %v906_v35, %v903_v33 }
  0xac   : > { %v909_v39 = vpop.permute.xlu0 %908 }
  0xad   : > { %vm911_vm4 = vcmp.eq.s32.totalorder %v909_v39, %v903_v33 }
  0xae   : > { %vm3336_vm5 = vmpackc.low %vm911_vm4, %vm910_vm3 }
  0xaf   : > { %3522 = vmatmul.mubr.msk.bf16.vlgmr.msra.gmra.mxu0 %vm3336_vm5, %v3955_v41 }
  0xf4   : > { %v1101_v10 = vpop.f32.mrf.mxu1 }
  0xf5   : > { %v1102_v11 = vadd.f32 %v3338_v9, %v1101_v10 }
  0xf6   : > { %v3535_v12 = vpop.f32.mrf.mxu1 }
  0xf7   : > { %v1107_v13 = vpack.c.bf16 %v1102_v11, %v1102_v11 }
  0xf8   : > { %v1104_v14 = vpop.f32.mrf.mxu1 }
  0xf9   : > { %3542 = vmatmul.mubr.msk.bf16.vlgmr.msra.gmra.mxu1 %vm1131_vm2, %v1107_v13 }
  0xfa   : > { %v3536_v15 = vpop.f32.mrf.mxu1  ;;  %3553 = vmatprep.mubr.msk.bf16.mxu1 %vm3953_vm0, %v3952_v1  ;;  %3546 = vmatpush3.bf16.msra.mxu1 %v3757_v16 }
  0xfb   : > { %3547 = vmatprep.subr.bf16.mxu1 %v3952_v1 }
  0xfe   : > { %3548 = vmatpush3.bf16.msra.mxu1 %v3758_v19 }
  0xff   : > { %3549 = vmatprep.subr.bf16.mxu1 %v3952_v1 }
 0x102   : > { %3550 = vmatpush3.bf16.msra.mxu1 %v3759_v21 }
 0x103   : > { %3551 = vmatprep.subr.bf16.mxu1 %v3952_v1 }
 0x106   : > { %3552 = vmatpush3.bf16.msra.mxu1 %v3760_v22 }
 0x16f   : > { %v1015_v49 = vpop.f32.mrf.mxu0 }
 0x170   : > { %v1290_v50 = vadd.f32 %v1288_v48, %v1015_v49 }
 0x171   : > { %v3523_v51 = vpop.f32.mrf.mxu0 }
 0x172   : > { %1291 = vst.msk [vmem:[#allocation2 + $0x4] sm:$0xff] %vm1131_vm2, %v1290_v50 }
 0x173   : > { %v1018_v52 = vpop.f32.mrf.mxu0 }
 0x174   : > { %v1308_v53 = vadd.f32 %v1288_v48, %v1018_v52 }
 0x175   : > { %v3524_v54 = vpop.f32.mrf.mxu0 }
 0x176   : > { %1309 = vst.msk [vmem:[#allocation2 + $0x10] sm:$0xff] %vm1131_vm2, %v1308_v53 }
 0x1b9   : > { %v1169_v34 = vpop.f32.mrf.mxu1 }
 0x1ba   : > { %v1170_v36 = vadd.f32 %v3344_v32, %v1169_v34 }
 0x1bb   : > { %v3543_v37 = vpop.f32.mrf.mxu1 }
 0x1bc   : > { %3769 = vtanh.f32 %v1170_v36 }
 0x1bd   : > { %v1172_v38 = vpop.f32.mrf.mxu1 }
 0x1bf   : > { %v3544_v40 = vpop.f32.mrf.mxu1 }
 0x1c9   : > { %v3770_v42 = vpop.eup %3769 }
 0x1ca   : > { %v1176_v43 = vpack.c.bf16 %v3770_v42, %v3770_v42 }
 0x1cc   : > { %3554 = vmatmul.mubr.msk.bf16.vlgmr.msra.gmra.mxu1 %vm1063_vm1, %v1176_v43 }
 0x28c   : > { %v1253_v56 = vpop.f32.mrf.mxu1 }
 0x28d   : > { %v1254_v57 = vadd.f32 %v3348_v55, %v1253_v56 }
 0x28e   : > { %v3555_v58 = vpop.f32.mrf.mxu1 }
 0x28f   : > { %1294 = vrot.lane.b32.xlu1 %v1254_v57, %s3956_s2  ;;  %v1266_v59 = vrot.slane %v1254_v57, 6  ;;  %v1262_v61 = vrot.slane %v1254_v57, 7  ;;  %v1270_v63 = vrot.slane %v1254_v57, 5  ;;  %v1292_v9 = vrot.slane %v1254_v57, 1 }
 0x290   : > { %v1256_v60 = vpop.f32.mrf.mxu1 }
 0x291   : > { %1267 = vrot.lane.b32.xlu0 %v1266_v59, %s3957_s3 }
 0x292   : > { %v3556_v62 = vpop.f32.mrf.mxu1 }
 0x293   : > { %1263 = vrot.lane.b32.xlu1 %v1262_v61, %s3956_s2 }
 0x295   : > { %1271 = vrot.lane.b32.xlu0 %v1270_v63, %s3958_s14 }
 0x297   : > { %1297 = vrot.lane.b32.xlu1 %v1262_v61, %s3957_s3 }
 0x29b   : > { %1300 = vrot.lane.b32.xlu1 %v1266_v59, %s3958_s14 }
 0x301   : > { %v1295_v0 = vpop.permute.xlu1 %1294 }
 0x302   : > { %v1303_v10 = vsel %vm1274_vm8, %v1292_v9, %v1295_v0 }
 0x303   : > { %v1268_v1 = vpop.permute.xlu0 %1267 }
 0x305   : > { %v1264_v2 = vpop.permute.xlu1 %1263 }
 0x306   : > { %v1275_v3 = vsel %vm1274_vm8, %v1254_v57, %v1264_v2 }
 0x307   : > { %v1277_v4 = vsel %vm1276_vm7, %v1275_v3, %v1268_v1  ;;  %v1272_v5 = vpop.permute.xlu0 %1271 }
 0x308   : > { %v1279_v6 = vsel %vm1278_vm9, %v1277_v4, %v1272_v5 }
 0x309   : > { %v1280_v7 = vadd.f32 %v1279_v6, %v1259_v44  ;;  %v1298_v8 = vpop.permute.xlu1 %1297 }
 0x30a   : > { %v1304_v11 = vsel %vm1276_vm7, %v1303_v10, %v1298_v8 }
 0x30b   : > { %1282 = vst.msk [vmem:[#allocation2] sm:$0xf] %vm1281_vm10, %v1280_v7 }
 0x30d   : > { %v1301_v12 = vpop.permute.xlu1 %1300 }
 0x30e   : > { %v1305_v13 = vsel %vm1278_vm9, %v1304_v11, %v1301_v12 }
 0x30f   : > { %v1306_v14 = vadd.f32 %v1305_v13, %v1259_v44 }
 0x311   : > { %1307 = vst.msk [vmem:[#allocation2 + $0xc] sm:$0xf] %vm1281_vm10, %v1306_v14 }
 0x312 PF: > { %v1310_v15 = vld [vmem:[#allocation2] sm:$0xff]  ;;  %vm1315_vm11 = vcmask 261120   ;;  %v1312_v16 = vld [vmem:[#allocation2 + $0x10] sm:$0xff]  ;;  %v3831_v36 = vld [vmem:[%s4124_s28 + $0x8] sm:$0xff]   ;;  %s4854_s25 = scalar_lea.vmem %s4802_s10, %s4106_s27  ;;  %s4855_s23 = scalar_lea.vmem %s4803_s11, %s4106_s27  ;;  %v3959_v7 = vmov 0.0   ;;  %vm1474_vm12 = vcmask 1043456  }
 0x313   : > { %v1316_v18 = vsel %vm1315_vm11, %v1310_v15, 0.0  ;;  %v1322_v19 = vsel %vm1315_vm11, %v1312_v16, 0.0  ;;  %v3832_v37 = vld [vmem:[%s4124_s28] sm:$0xff]   ;;  %3557 = vmatprep.subr.bf16.mxu0 %v3831_v36  ;;  %s4856_s14 = scalar_lea.vmem %s4805_s13, %s4106_s27  ;;  %3577 = vmatprep.subr.bf16.mxu1 %v3959_v7  ;;  %s3960_s28 = smov 112   ;;  %vm3962_vm13 = vmmov 0   ;;  %vm1509_vm14 = vcmask 64512  }
 0x314   : > { %1317 = vadd.xlane.f32.xlu0 %v1316_v18  ;;  %1323 = vadd.xlane.f32.xlu1 %v1322_v19  ;;  %v3354_v49 = vld [vmem:[%s4854_s25] ss:$0 sm:$0xff]  ;;  %s3961_s7 = smov 120   ;;  %s3963_s25 = smov 104   ;;  %vm1950_vm0 = vcmask 97280   ;;  %vm1954_vm2 = vcmask 93184  }
 0x315   : > { %3558 = vmatpush3.bf16.msra.mxu0 %v3831_v36  ;;  %v3355_v55 = vld [vmem:[%s4855_s23] ss:$0 sm:$0xff]  ;;  %3579 = vmatprep.mubr.msk.bf16.mxu1 %vm3962_vm13, %v3959_v7  ;;  %s3964_s1 = smov 96   ;;  %s3965_s5 = smov 64   ;;  %vm2141_vm3 = vcmask 1045504   ;;  %vm2555_vm4 = vcmask 130048  }
 0x316   : > { %3559 = vmatprep.subr.bf16.mxu0 %v3832_v37  ;;  %v3356_v0 = vld [vmem:[%s4856_s14] ss:$0 sm:$0xff]  ;;  %s3966_s23 = smov 8   ;;  %s4861_s2 = sld [smem:[#allocation4_spill]]  ;;  %vm2558_vm5 = vcmask 195584  }
 0x317   : > { %s3967_s3 = smov 16   ;;  %s3968_s14 = smov 24  }
 0x318   : > { %v1311_v17 = vld [vmem:[#allocation2 + $0x8] sm:$0xff]  ;;  %p3398_p5 = scmp.ne.s32.totalorder %s4100_s26, 1 }
 0x319   : > { %v1319_v20 = vsel %vm1315_vm11, %v1311_v17, 0.0  ;;  %3560 = vmatpush3.bf16.msra.mxu0 %v3832_v37 }
 0x31a   : > { %1320 = vadd.xlane.f32.xlu0 %v1319_v20  ;;  %3565 = vmatprep.subr.bf16.mxu0 %v3959_v7 }
 0x39d   : > { %v1318_v21 = vpop.xlane.xlu0 %1317  ;;  %v1324_v22 = vpop.xlane.xlu1 %1323 }
 0x39e   : > { %v1326_v23 = vmul.f32 0.03125, %v1318_v21  ;;  %v1328_v24 = vmul.f32 0.03125, %v1324_v22 }
 0x3a0   : > { %v1329_v25 = vsub.f32 %v1310_v15, %v1326_v23  ;;  %v1331_v26 = vsub.f32 %v1312_v16, %v1328_v24 }
 0x3a2   : > { %v1332_v29 = vmul.f32 %v1329_v25, %v1329_v25  ;;  %v1334_v30 = vmul.f32 %v1331_v26, %v1331_v26 }
 0x3a3   : > { %v1321_v27 = vpop.xlane.xlu0 %1320 }
 0x3a4   : > { %v1327_v28 = vmul.f32 0.03125, %v1321_v27  ;;  %v1335_v32 = vsel %vm1315_vm11, %v1332_v29, 0.0  ;;  %v1341_v33 = vsel %vm1315_vm11, %v1334_v30, 0.0 }
 0x3a5   : > { %1336 = vadd.xlane.f32.xlu1 %v1335_v32 }
 0x3a6   : > { %v1330_v31 = vsub.f32 %v1311_v17, %v1327_v28 }
 0x3a8   : > { %v1333_v34 = vmul.f32 %v1330_v31, %v1330_v31 }
 0x3a9   : > { %1342 = vadd.xlane.f32.xlu1 %v1341_v33 }
 0x3aa   : > { %v1338_v35 = vsel %vm1315_vm11, %v1333_v34, 0.0 }
 0x3ab   : > { %1339 = vadd.xlane.f32.xlu0 %v1338_v35 }
 0x42e   : > { %v1337_v38 = vpop.xlane.xlu1 %1336 }
 0x42f   : > { %v1344_v39 = vmul.f32 0.03125, %v1337_v38 }
 0x431   : > { %v1347_v40 = vadd.f32 1e-05, %v1344_v39 }
 0x432   : > { %v1343_v41 = vpop.xlane.xlu1 %1342 }
 0x433   : > { %3845 = vrsqrt.f32 %v1347_v40  ;;  %v1346_v43 = vmul.f32 0.03125, %v1343_v41 }
 0x434   : > { %v1340_v42 = vpop.xlane.xlu0 %1339 }
 0x435   : > { %v1345_v44 = vmul.f32 0.03125, %v1340_v42  ;;  %v1349_v45 = vadd.f32 1e-05, %v1346_v43 }
 0x437   : > { %v1348_v46 = vadd.f32 1e-05, %v1345_v44  ;;  %3847 = vrsqrt.f32 %v1349_v45 }
 0x439   : > { %3849 = vrsqrt.f32 %v1348_v46 }
 0x440   : > { %v3846_v47 = vpop.eup %3845 }
 0x441   : > { %v1353_v48 = vmul.f32 %v3846_v47, %v1329_v25 }
 0x443   : > { %v1362_v54 = vmul.f32 %v3354_v49, %v1353_v48 }
 0x444   : > { %v3848_v50 = vpop.eup %3847 }
 0x445   : > { %v1355_v52 = vmul.f32 %v3848_v50, %v1331_v26  ;;  %v1371_v59 = vadd.f32 %v3355_v55, %v1362_v54 }
 0x446   : > { %v3850_v51 = vpop.eup %3849 }
 0x447   : > { %v1354_v53 = vmul.f32 %v3850_v51, %v1330_v31  ;;  %v1364_v56 = vmul.f32 %v3354_v49, %v1355_v52 }
 0x449   : > { %v1363_v57 = vmul.f32 %v3354_v49, %v1354_v53  ;;  %v1373_v58 = vadd.f32 %v3355_v55, %v1364_v56 }
 0x44b   : > { %v1372_v60 = vadd.f32 %v3355_v55, %v1363_v57  ;;  %v1375_v61 = vpack.c.bf16 %v1373_v58, %v1373_v58  ;;  %v1923_v55 = vlaneseq }
 0x44d   : > { %v1374_v62 = vpack.c.bf16 %v1372_v60, %v1371_v59  ;;  %v1924_v56 = vshrl.u32 %v1923_v55, 7  ;;  %v1927_v57 = vand.u32 127, %v1923_v55 }
 0x44f   : > { %3561 = vmatprep.mubr.msk.bf16.mxu0 %vm1315_vm11, %v1374_v62  ;;  %vm4384_vm15 = vcmp.le.s32.totalorder %v1927_v57, %v1924_v56  ;;  %v1925_v60 = vadd.s32 8, %v1924_v56 }
 0x450   : > { %3562 = vmatmul.mubr.msk.bf16.vlgmr.msra.gmra.mxu0 %vm1315_vm11, %v1375_v61 }
 0x451   : > { %3567 = vmatprep.mubr.msk.bf16.mxu0 %vm3962_vm13, %v3959_v7  ;;  %vm4394_vm1 = vcmp.le.s32.totalorder %v1927_v57, %v1925_v60 }
 0x510   : > { %v3563_v63 = vpop.f32.mrf.mxu0 }
 0x511   : > { %v1448_v3 = vadd.f32 %v3563_v63, %v3356_v0 }
 0x512   : > { %v1439_v1 = vpop.f32.mrf.mxu0 }
 0x513   : > { %v1440_v5 = vadd.f32 %v3356_v0, %v1439_v1  ;;  %v1476_v8 = vrot.slane %v1448_v3, 4 }
 0x514   : > { %v3564_v2 = vpop.f32.mrf.mxu0 }
 0x516   : > { %v1442_v4 = vpop.f32.mrf.mxu0 }
 0x517   : > { %v1443_v6 = vadd.f32 %v3356_v0, %v1442_v4 }
 0x519   : > { %v3776_v9 = vpack.i.bf16 %v1443_v6, %v1440_v5  ;;  %v1475_v10 = vrot.slane %v1443_v6, 4  ;;  %v4306_v14 = vpack.c.bf16 %v1443_v6, %v1440_v5 }
 0x51b   : > { %3777 = vrot.lane.b32.xlu1 %v3776_v9, %s3960_s28  ;;  %3772 = vrot.lane.b32.xlu0 %v3776_v9, %s3961_s7  ;;  %v1477_v11 = vsel %vm1474_vm12, %v1475_v10, %v1476_v8 }
 0x51c   : > { %v3791_v12 = vpack.i.bf16 %v1476_v8, %v1477_v11  ;;  %v4300_v13 = vpack.c.bf16 %v1476_v8, %v1477_v11 }
 0x51f   : > { %3782 = vrot.lane.b32.xlu1 %v3776_v9, %s3963_s25  ;;  %3792 = vrot.lane.b32.xlu0 %v3791_v12, %s3960_s28 }
 0x523   : > { %3787 = vrot.lane.b32.xlu1 %v3791_v12, %s3961_s7  ;;  %1507 = vrot.lane.b32.xlu0 %v4306_v14, %s3964_s1  ;;  %s4865_s7 = sld [smem:[#allocation7_spill]] (!%p3398_p5) }
 0x527   : > { %3797 = vrot.lane.b32.xlu1 %v3791_v12, %s3963_s25  ;;  %s4862_s25 = scalar_lea.vmem %s4807_s15, %s4106_s27 }
 0x58d   : > { %v3778_v15 = vpop.permute.xlu1 %3777  ;;  %v3773_v16 = vpop.permute.xlu0 %3772 }
 0x58e   : > { %v3780_v17 = vunpack.i.h.bf16 %v3778_v15  ;;  %v3779_v18 = vunpack.i.l.bf16 %v3778_v15  ;;  %v3775_v19 = vunpack.i.h.bf16 %v3773_v16  ;;  %v3774_v20 = vunpack.i.l.bf16 %v3773_v16 }
 0x590   : > { %v4310_v21 = vpack.c.bf16 %v3780_v17, %v3779_v18  ;;  %v4312_v22 = vpack.c.bf16 %v3775_v19, %v3774_v20 }
 0x591   : > { %v3783_v23 = vpop.permute.xlu1 %3782  ;;  %v3793_v24 = vpop.permute.xlu0 %3792 }
 0x592   : > { %v3785_v25 = vunpack.i.h.bf16 %v3783_v23  ;;  %v3784_v26 = vunpack.i.l.bf16 %v3783_v23  ;;  %1558 = vrot.lane.b32.xlu1 %v4312_v22, %s3964_s1  ;;  %1608 = vrot.lane.b32.xlu0 %v4310_v21, %s3964_s1  ;;  %v3795_v28 = vunpack.i.h.bf16 %v3793_v24  ;;  %v3794_v29 = vunpack.i.l.bf16 %v3793_v24 }
 0x594   : > { %v4318_v27 = vpack.c.bf16 %v3785_v25, %v3784_v26  ;;  %v4325_v35 = vpack.c.bf16 %v3795_v28, %v3794_v29 }
 0x595   : > { %v3788_v30 = vpop.permute.xlu1 %3787  ;;  %v1508_v31 = vpop.permute.xlu0 %1507 }
 0x596   : > { %v3790_v32 = vunpack.i.h.bf16 %v3788_v30  ;;  %v3789_v33 = vunpack.i.l.bf16 %v3788_v30  ;;  %v1514_v34 = vsel %vm1509_vm14, %v1508_v31, 0  ;;  %1658 = vrot.lane.b32.xlu1 %v4318_v27, %s3964_s1  ;;  %1708 = vrot.lane.b32.xlu0 %v4300_v13, %s3964_s1 }
 0x597   : > { %3566 = vmatpush3.bf16.xpose.msra.mxu0 %v1514_v34 }
 0x598   : > { %v4327_v36 = vpack.c.bf16 %v3790_v32, %v3789_v33  ;;  %3571 = vmatprep.subr.bf16.mxu0 %v3959_v7 }
 0x599   : > { %v3798_v37 = vpop.permute.xlu1 %3797 }
 0x59a   : > { %v3800_v38 = vunpack.i.h.bf16 %v3798_v37  ;;  %v3799_v39 = vunpack.i.l.bf16 %v3798_v37  ;;  %1758 = vrot.lane.b32.xlu1 %v4327_v36, %s3964_s1  ;;  %1808 = vrot.lane.b32.xlu0 %v4325_v35, %s3964_s1 }
 0x59c   : > { %v4334_v40 = vpack.c.bf16 %v3800_v38, %v3799_v39 }
 0x59e   : > { %1858 = vrot.lane.b32.xlu1 %v4334_v40, %s3964_s1  ;;  %3568 = vmatmul.mubr.msk.bf16.vlgmr.msra.gmra.mxu0 %vm1509_vm14, %v4306_v14 }
 0x59f   : > { %3573 = vmatprep.mubr.msk.bf16.mxu0 %vm3962_vm13, %v3959_v7 }
 0x604   : > { %v1559_v41 = vpop.permute.xlu1 %1558  ;;  %v1609_v42 = vpop.permute.xlu0 %1608 }
 0x605   : > { %v1564_v43 = vsel %vm1509_vm14, %v1559_v41, 0  ;;  %v1614_v44 = vsel %vm1509_vm14, %v1609_v42, 0 }
 0x606   : > { %3572 = vmatpush3.bf16.xpose.msra.mxu0 %v1564_v43  ;;  %3578 = vmatpush3.bf16.xpose.msra.mxu1 %v1614_v44 }
 0x607   : > { %3583 = vmatprep.subr.bf16.mxu0 %v3959_v7  ;;  %3589 = vmatprep.subr.bf16.mxu1 %v3959_v7 }
 0x608   : > { %v1659_v45 = vpop.permute.xlu1 %1658  ;;  %v1709_v46 = vpop.permute.xlu0 %1708 }
 0x609   : > { %v1664_v47 = vsel %vm1509_vm14, %v1659_v45, 0  ;;  %v1714_v48 = vsel %vm1509_vm14, %v1709_v46, 0 }
 0x60c   : > { %v1759_v49 = vpop.permute.xlu1 %1758  ;;  %v1809_v50 = vpop.permute.xlu0 %1808 }
 0x60d   : > { %3574 = vmatmul.mubr.msk.bf16.vlgmr.msra.gmra.mxu0 %vm1509_vm14, %v4312_v22  ;;  %3580 = vmatmul.mubr.msk.bf16.vlgmr.msra.gmra.mxu1 %vm1509_vm14, %v4310_v21  ;;  %v1764_v51 = vsel %vm1509_vm14, %v1759_v49, 0  ;;  %v1814_v52 = vsel %vm1509_vm14, %v1809_v50, 0 }
 0x60e   : > { %3584 = vmatpush3.bf16.xpose.msra.mxu0 %v1664_v47  ;;  %3590 = vmatpush3.bf16.xpose.msra.mxu1 %v1714_v48 }
 0x60f   : > { %3585 = vmatprep.mubr.msk.bf16.mxu0 %vm3962_vm13, %v3959_v7  ;;  %3591 = vmatprep.mubr.msk.bf16.mxu1 %vm3962_vm13, %v3959_v7 }
 0x610   : > { %3595 = vmatprep.subr.bf16.mxu0 %v3959_v7  ;;  %3601 = vmatprep.subr.bf16.mxu1 %v3959_v7  ;;  %v1859_v53 = vpop.permute.xlu1 %1858 }
 0x611   : > { %v1864_v54 = vsel %vm1509_vm14, %v1859_v53, 0 }
 0x615   : > { %3586 = vmatmul.mubr.msk.bf16.vlgmr.msra.gmra.mxu0 %vm1509_vm14, %v4318_v27  ;;  %3592 = vmatmul.mubr.msk.bf16.vlgmr.msra.gmra.mxu1 %vm1509_vm14, %v4300_v13 }
 0x616   : > { %3596 = vmatpush3.bf16.xpose.msra.mxu0 %v1764_v51  ;;  %3602 = vmatpush3.bf16.xpose.msra.mxu1 %v1814_v52 }
 0x617   : > { %3597 = vmatprep.mubr.msk.bf16.mxu0 %vm3962_vm13, %v3959_v7  ;;  %3603 = vmatprep.mubr.msk.bf16.mxu1 %vm3962_vm13, %v3959_v7 }
 0x618   : > { %3607 = vmatprep.subr.bf16.mxu0 %v3959_v7  ;;  %3613 = vmatprep.subr.bf16.mxu1 %v3959_v7 }
 0x61d   : > { %3598 = vmatmul.mubr.msk.bf16.vlgmr.msra.gmra.mxu0 %vm1509_vm14, %v4327_v36  ;;  %3604 = vmatmul.mubr.msk.bf16.vlgmr.msra.gmra.mxu1 %vm1509_vm14, %v4325_v35 }
 0x61e   : > { %3608 = vmatpush3.bf16.xpose.msra.mxu0 %v1864_v54  ;;  %3609 = vmatprep.mubr.msk.bf16.mxu0 %vm3962_vm13, %v3959_v7 }
 0x61f   : > { %3619 = vmatprep.subr.bf16.mxu0 %v3959_v7  ;;  %3615 = vmatprep.mubr.msk.bf16.mxu1 %vm3962_vm13, %v3959_v7 }
 0x625   : > { %3610 = vmatmul.mubr.msk.bf16.vlgmr.msra.gmra.mxu0 %vm1509_vm14, %v4334_v40 }
 0x626   : > { %3621 = vmatprep.mubr.msk.bf16.mxu0 %vm3962_vm13, %v3959_v7 }
 0x65e   : > { %v1550_v58 = vpop.f32.mrf.mxu0 }
 0x65f   : > { %v1907_v61 = vmul.f32 0.35355338, %v1550_v58 }
 0x660   : > { %v3569_v62 = vpop.f32.mrf.mxu0 }
 0x661   : > { %v4390_v63 = vsel %vm4384_vm15, %v1907_v61, -1e+09 }
 0x662   : > { %v1553_v0 = vpop.f32.mrf.mxu0  ;;  %v1951_v1 = vsel %vm1950_vm0, %v4390_v63, -inf }
 0x663   : > { %v1908_v3 = vmul.f32 0.35355338, %v1553_v0  ;;  %1952 = vmax.xlane.f32.xlu0 %v1951_v1 }
 0x664   : > { %v3570_v4 = vpop.f32.mrf.mxu0 }
 0x665   : > { %v4400_v5 = vsel %vm4394_vm1, %v1908_v3, -1e+09 }
 0x666   : > { %v1955_v6 = vsel %vm1954_vm2, %v4400_v5, -inf }
 0x667   : > { %1956 = vmax.xlane.f32.xlu1 %v1955_v6 }
 0x6cd   : > { %v1600_v8 = vpop.f32.mrf.mxu0  ;;  %v1650_v9 = vpop.f32.mrf.mxu1 }
 0x6ce   : > { %v1909_v10 = vmul.f32 0.35355338, %v1600_v8  ;;  %v1911_v19 = vmul.f32 0.35355338, %v1650_v9 }
 0x6cf   : > { %v3575_v11 = vpop.f32.mrf.mxu0  ;;  %v3581_v12 = vpop.f32.mrf.mxu1 }
 0x6d0   : > { %v4406_v15 = vsel %vm4384_vm15, %v1909_v10, -1e+09  ;;  %v4424_v34 = vsel %vm4384_vm15, %v1911_v19, -1e+09 }
 0x6d1   : > { %v1603_v16 = vpop.f32.mrf.mxu0  ;;  %v1653_v17 = vpop.f32.mrf.mxu1  ;;  %v1958_v18 = vsel %vm1950_vm0, %v4406_v15, -inf  ;;  %v1964_v43 = vsel %vm1950_vm0, %v4424_v34, -inf }
 0x6d2   : > { %v1910_v20 = vmul.f32 0.35355338, %v1603_v16  ;;  %v1912_v23 = vmul.f32 0.35355338, %v1653_v17  ;;  %1959 = vmax.xlane.f32.xlu0 %v1958_v18 }
 0x6d3   : > { %v3576_v24 = vpop.f32.mrf.mxu0  ;;  %v3582_v25 = vpop.f32.mrf.mxu1 }
 0x6d4   : > { %v4412_v26 = vsel %vm4394_vm1, %v1910_v20, -1e+09  ;;  %v4416_v28 = vsel %vm4394_vm1, %v1912_v23, -1e+09 }
 0x6d5   : > { %v1700_v29 = vpop.f32.mrf.mxu0  ;;  %v1750_v30 = vpop.f32.mrf.mxu1  ;;  %v1961_v31 = vsel %vm1954_vm2, %v4412_v26, -inf  ;;  %v1967_v32 = vsel %vm1954_vm2, %v4416_v28, -inf }
 0x6d6   : > { %v1913_v33 = vmul.f32 0.35355338, %v1700_v29  ;;  %1962 = vmax.xlane.f32.xlu0 %v1961_v31  ;;  %1968 = vmax.xlane.f32.xlu1 %v1967_v32  ;;  %v1915_v39 = vmul.f32 0.35355338, %v1750_v30 }
 0x6d7   : > { %v3587_v37 = vpop.f32.mrf.mxu0  ;;  %v3593_v38 = vpop.f32.mrf.mxu1 }
 0x6d8   : > { %v4430_v46 = vsel %vm4384_vm15, %v1913_v33, -1e+09  ;;  %v4442_v55 = vsel %vm4384_vm15, %v1915_v39, -1e+09 }
 0x6d9   : > { %v1703_v41 = vpop.f32.mrf.mxu0  ;;  %v1753_v42 = vpop.f32.mrf.mxu1  ;;  %v1970_v52 = vsel %vm1950_vm0, %v4430_v46, -inf  ;;  %v1976_v0 = vsel %vm1950_vm0, %v4442_v55, -inf }
 0x6da   : > { %v1914_v44 = vmul.f32 0.35355338, %v1703_v41  ;;  %v1916_v45 = vmul.f32 0.35355338, %v1753_v42  ;;  %1965 = vmax.xlane.f32.xlu0 %v1964_v43 }
 0x6db   : > { %v3588_v47 = vpop.f32.mrf.mxu0  ;;  %v3594_v48 = vpop.f32.mrf.mxu1 }
 0x6dc   : > { %v4434_v49 = vsel %vm4394_vm1, %v1914_v44, -1e+09  ;;  %v4446_v56 = vsel %vm4394_vm1, %v1916_v45, -1e+09 }
 0x6dd   : > { %v1800_v50 = vpop.f32.mrf.mxu0  ;;  %v1850_v51 = vpop.f32.mrf.mxu1  ;;  %v1973_v53 = vsel %vm1954_vm2, %v4434_v49, -inf  ;;  %v1979_v1 = vsel %vm1954_vm2, %v4446_v56, -inf }
 0x6de   : > { %v1917_v54 = vmul.f32 0.35355338, %v1800_v50  ;;  %1971 = vmax.xlane.f32.xlu0 %v1970_v52  ;;  %1974 = vmax.xlane.f32.xlu1 %v1973_v53  ;;  %v1919_v60 = vmul.f32 0.35355338, %v1850_v51 }
 0x6df   : > { %v3599_v57 = vpop.f32.mrf.mxu0  ;;  %v3605_v58 = vpop.f32.mrf.mxu1 }
 0x6e0   : > { %v4454_v6 = vsel %vm4384_vm15, %v1917_v54, -1e+09  ;;  %v4466_v18 = vsel %vm4384_vm15, %v1919_v60, -1e+09 }
 0x6e1   : > { %v1803_v61 = vpop.f32.mrf.mxu0  ;;  %v1853_v62 = vpop.f32.mrf.mxu1  ;;  %v1982_v12 = vsel %vm1950_vm0, %v4454_v6, -inf  ;;  %v1988_v24 = vsel %vm1950_vm0, %v4466_v18, -inf }
 0x6e2   : > { %v1918_v3 = vmul.f32 0.35355338, %v1803_v61  ;;  %v1920_v4 = vmul.f32 0.35355338, %v1853_v62  ;;  %1977 = vmax.xlane.f32.xlu0 %v1976_v0  ;;  %1980 = vmax.xlane.f32.xlu1 %v1979_v1 }
 0x6e3   : > { %v3600_v8 = vpop.f32.mrf.mxu0  ;;  %v3606_v9 = vpop.f32.mrf.mxu1 }
 0x6e4   : > { %v4458_v10 = vsel %vm4394_vm1, %v1918_v3, -1e+09  ;;  %v4470_v19 = vsel %vm4394_vm1, %v1920_v4, -1e+09 }
 0x6e5   : > { %v1900_v11 = vpop.f32.mrf.mxu0  ;;  %v1985_v16 = vsel %vm1954_vm2, %v4458_v10, -inf  ;;  %v1991_v25 = vsel %vm1954_vm2, %v4470_v19, -inf }
 0x6e6   : > { %v1921_v17 = vmul.f32 0.35355338, %v1900_v11  ;;  %1983 = vmax.xlane.f32.xlu0 %v1982_v12  ;;  %1986 = vmax.xlane.f32.xlu1 %v1985_v16 }
 0x6e7   : > { %v3611_v20 = vpop.f32.mrf.mxu0 }
 0x6e8   : > { %v4478_v29 = vsel %vm4384_vm15, %v1921_v17, -1e+09 }
 0x6e9   : > { %v1903_v23 = vpop.f32.mrf.mxu0  ;;  %v1994_v31 = vsel %vm1950_vm0, %v4478_v29, -inf }
 0x6ea   : > { %1989 = vmax.xlane.f32.xlu0 %v1988_v24  ;;  %1992 = vmax.xlane.f32.xlu1 %v1991_v25  ;;  %v1922_v37 = vmul.f32 0.35355338, %v1903_v23 }
 0x6eb   : > { %v3612_v30 = vpop.f32.mrf.mxu0 }
 0x6ec   : > { %v1953_v59 = vpop.xlane.xlu0 %1952 }
 0x6ed   : > { %v2000_v32 = vsub.f32 %v4390_v63, %v1953_v59 }
 0x6ee   : > { %1995 = vmax.xlane.f32.xlu0 %v1994_v31 }
 0x6ef   : > { %v2016_v33 = vmul.f32 1.442695, %v2000_v32 }
 0x6f1   : > { %3851 = vpow2.f32 %v2016_v33 }
 0x6fb   : > { %2186 = vrot.lane.b32.xlu1 %v4312_v22, %s3965_s5 }
 0x6fe   : > { %v4493_v38 = vpop.eup %3851 }
 0x6ff   : > { %2235 = vrot.lane.b32.xlu1 %v4310_v21, %s3965_s5  ;;  %v4497_v21 = vsel %vm4394_vm1, %v1922_v37, -1e+09 }
 0x700   : > { %v1997_v22 = vsel %vm1954_vm2, %v4497_v21, -inf }
 0x703   : > { %2284 = vrot.lane.b32.xlu1 %v4318_v27, %s3965_s5 }
 0x704   : > { %2136 = vrot.lane.b32.xlu0 %v4306_v14, %s3965_s5  ;;  %v2048_v14 = vsel %vm1950_vm0, %v4493_v38, 0.0 }
 0x708   : > { %2333 = vrot.lane.b32.xlu0 %v4300_v13, %s3965_s5  ;;  %v1957_v13 = vpop.xlane.xlu1 %1956 }
 0x709   : > { %v2001_v27 = vsub.f32 %v4400_v5, %v1957_v13 }
 0x70b   : > { %v2018_v63 = vmul.f32 1.442695, %v2001_v27 }
 0x70d   : > { %3853 = vpow2.f32 %v2018_v63 }
 0x71a   : > { %v4506_v39 = vpop.eup %3853 }
 0x71b   : > { %v2051_v41 = vsel %vm1954_vm2, %v4506_v39, 0.0 }
 0x727   : > { %1998 = vmax.xlane.f32.xlu1 %v1997_v22  ;;  %2049 = vadd.xlane.f32.xlu0 %v2048_v14 }
 0x738   : > { %2382 = vrot.lane.b32.xlu1 %v4327_v36, %s3965_s5 }
 0x75b   : > { %v1960_v2 = vpop.xlane.xlu0 %1959 }
 0x75c   : > { %v2002_v42 = vsub.f32 %v4406_v15, %v1960_v2  ;;  %2052 = vadd.xlane.f32.xlu1 %v2051_v41 }
 0x75e   : > { %v2020_v43 = vmul.f32 1.442695, %v2002_v42 }
 0x75f   : > { %v1969_v44 = vpop.xlane.xlu1 %1968  ;;  %v1963_v45 = vpop.xlane.xlu0 %1962 }
 0x760   : > { %3855 = vpow2.f32 %v2020_v43  ;;  %v2005_v36 = vsub.f32 %v4416_v28, %v1969_v44  ;;  %v2003_v47 = vsub.f32 %v4412_v26, %v1963_v45 }
 0x762   : > { %v2022_v5 = vmul.f32 1.442695, %v2003_v47  ;;  %v2026_v48 = vmul.f32 1.442695, %v2005_v36 }
 0x763   : > { %v1966_v50 = vpop.xlane.xlu0 %1965 }
 0x764   : > { %v2004_v51 = vsub.f32 %v4424_v34, %v1966_v50  ;;  %3857 = vpow2.f32 %v2022_v5 }
 0x765   : > { %3859 = vpow2.f32 %v2026_v48 }
 0x766   : > { %v2024_v52 = vmul.f32 1.442695, %v2004_v51 }
 0x767   : > { %v1975_v53 = vpop.xlane.xlu1 %1974  ;;  %v1972_v54 = vpop.xlane.xlu0 %1971 }
 0x768   : > { %3861 = vpow2.f32 %v2024_v52  ;;  %v2007_v15 = vsub.f32 %v4434_v49, %v1975_v53  ;;  %v2006_v57 = vsub.f32 %v4430_v46, %v1972_v54 }
 0x76a   : > { %v2030_v58 = vmul.f32 1.442695, %v2007_v15  ;;  %v2028_v60 = vmul.f32 1.442695, %v2006_v57 }
 0x76b   : > { %v1981_v28 = vpop.xlane.xlu1 %1980  ;;  %v1978_v61 = vpop.xlane.xlu0 %1977 }
 0x76c   : > { %3863 = vpow2.f32 %v2030_v58  ;;  %v2009_v26 = vsub.f32 %v4446_v56, %v1981_v28  ;;  %v2008_v62 = vsub.f32 %v4442_v55, %v1978_v61 }
 0x76d   : > { %v4518_v34 = vpop.eup %3855  ;;  %3865 = vpow2.f32 %v2028_v60 }
 0x76e   : > { %v2034_v0 = vmul.f32 1.442695, %v2009_v26  ;;  %v2032_v1 = vmul.f32 1.442695, %v2008_v62  ;;  %v2054_v3 = vsel %vm1950_vm0, %v4518_v34, 0.0 }
 0x76f   : > { %v1987_v49 = vpop.xlane.xlu1 %1986  ;;  %2055 = vadd.xlane.f32.xlu0 %v2054_v3  ;;  %v1984_v46 = vpop.xlane.xlu0 %1983 }
 0x770   : > { %3867 = vpow2.f32 %v2034_v0  ;;  %v2011_v4 = vsub.f32 %v4458_v10, %v1987_v49  ;;  %v2010_v8 = vsub.f32 %v4454_v6, %v1984_v46 }
 0x771   : > { %3869 = vpow2.f32 %v2032_v1  ;;  %v4524_v56 = vpop.eup %3857 }
 0x772   : > { %v2038_v55 = vmul.f32 1.442695, %v2011_v4  ;;  %v2036_v9 = vmul.f32 1.442695, %v2010_v8  ;;  %v2057_v12 = vsel %vm1954_vm2, %v4524_v56, 0.0  ;;  %v4528_v17 = vpop.eup %3859 }
 0x773   : > { %v1993_v11 = vpop.xlane.xlu1 %1992  ;;  %v1990_v16 = vpop.xlane.xlu0 %1989  ;;  %2058 = vadd.xlane.f32.xlu1 %v2057_v12  ;;  %v2063_v31 = vsel %vm1954_vm2, %v4528_v17, 0.0 }
 0x774   : > { %3871 = vpow2.f32 %v2038_v55  ;;  %v2013_v20 = vsub.f32 %v4470_v19, %v1993_v11  ;;  %v2012_v10 = vsub.f32 %v4466_v18, %v1990_v16 }
 0x775   : > { %v4532_v23 = vpop.eup %3861  ;;  %3873 = vpow2.f32 %v2036_v9 }
 0x776   : > { %v2042_v6 = vmul.f32 1.442695, %v2013_v20  ;;  %v2040_v24 = vmul.f32 1.442695, %v2012_v10  ;;  %v2060_v25 = vsel %vm1950_vm0, %v4532_v23, 0.0 }
 0x777   : > { %v2187_v30 = vpop.permute.xlu1 %2186  ;;  %2061 = vadd.xlane.f32.xlu0 %v2060_v25  ;;  %v1996_v59 = vpop.xlane.xlu0 %1995  ;;  %2064 = vadd.xlane.f32.xlu1 %v2063_v31 }
 0x778   : > { %3875 = vpow2.f32 %v2042_v6  ;;  %v2192_v19 = vsel %vm2141_vm3, %v2187_v30, 0  ;;  %v2014_v18 = vsub.f32 %v4478_v29, %v1996_v59 }
 0x779   : > { %v4540_v32 = vpop.eup %3863  ;;  %3877 = vpow2.f32 %v2040_v24  ;;  %3620 = vmatpush3.bf16.msra.mxu0 %v2192_v19 }
 0x77a   : > { %v4542_v33 = vpop.eup %3865  ;;  %v2044_v37 = vmul.f32 1.442695, %v2014_v18  ;;  %v2069_v22 = vsel %vm1954_vm2, %v4540_v32, 0.0  ;;  %3631 = vmatprep.subr.bf16.mxu0 %v3959_v7 }
 0x77b   : > { %v2066_v14 = vsel %vm1950_vm0, %v4542_v33, 0.0  ;;  %v2137_v13 = vpop.permute.xlu0 %2136  ;;  %2070 = vadd.xlane.f32.xlu1 %v2069_v22  ;;  %v2236_v52 = vpop.permute.xlu1 %2235 }
 0x77c   : > { %3879 = vpow2.f32 %v2044_v37  ;;  %2067 = vadd.xlane.f32.xlu0 %v2066_v14  ;;  %v2143_v29 = vsel %vm2141_vm3, %v2137_v13, 0  ;;  %v2241_v49 = vsel %vm2141_vm3, %v2236_v52, 0 }
 0x77d   : > { %v4550_v27 = vpop.eup %3867  ;;  %3614 = vmatpush3.bf16.msra.mxu1 %v2143_v29 }
 0x77e   : > { %v4552_v63 = vpop.eup %3869  ;;  %v2075_v2 = vsel %vm1954_vm2, %v4550_v27, 0.0  ;;  %3625 = vmatprep.subr.bf16.mxu1 %v3959_v7 }
 0x77f   : > { %v2072_v41 = vsel %vm1950_vm0, %v4552_v63, 0.0  ;;  %2076 = vadd.xlane.f32.xlu1 %v2075_v2  ;;  %v2285_v53 = vpop.permute.xlu1 %2284  ;;  %v2334_v28 = vpop.permute.xlu0 %2333 }
 0x780   : > { %2073 = vadd.xlane.f32.xlu0 %v2072_v41  ;;  %v2290_v59 = vsel %vm2141_vm3, %v2285_v53, 0 }
 0x781   : > { %v4559_v42 = vpop.eup %3871 }
 0x782   : > { %v4561_v43 = vpop.eup %3873  ;;  %v2081_v44 = vsel %vm1954_vm2, %v4559_v42, 0.0 }
 0x783   : > { %v2078_v45 = vsel %vm1950_vm0, %v4561_v43, 0.0  ;;  %2082 = vadd.xlane.f32.xlu1 %v2081_v44 }
 0x784   : > { %2079 = vadd.xlane.f32.xlu0 %v2078_v45 }
 0x785   : > { %v4567_v36 = vpop.eup %3875 }
 0x786   : > { %v4569_v47 = vpop.eup %3877  ;;  %v2087_v5 = vsel %vm1954_vm2, %v4567_v36, 0.0 }
 0x787   : > { %v2084_v48 = vsel %vm1950_vm0, %v4569_v47, 0.0  ;;  %2088 = vadd.xlane.f32.xlu1 %v2087_v5 }
 0x788   : > { %2085 = vadd.xlane.f32.xlu0 %v2084_v48 }
 0x789   : > { %v4575_v50 = vpop.eup %3879 }
 0x78a   : > { %v2090_v51 = vsel %vm1950_vm0, %v4575_v50, 0.0 }
 0x78c   : > { %2091 = vadd.xlane.f32.xlu0 %v2090_v51 }
 0x7a2   : > { %2431 = vrot.lane.b32.xlu0 %v4325_v35, %s3965_s5 }
 0x7b0   : > { %v1999_v54 = vpop.xlane.xlu1 %1998  ;;  %v2050_v61 = vpop.xlane.xlu0 %2049 }
 0x7b1   : > { %v2015_v15 = vsub.f32 %v4497_v21, %v1999_v54 }
 0x7b3   : > { %v2046_v57 = vmul.f32 1.442695, %v2015_v15 }
 0x7b4   : > { %v4588_v26 = vpop.permute.xlu1 %2382 }
 0x7b5   : > { %3881 = vpow2.f32 %v2046_v57  ;;  %v2388_v45 = vsel %vm2141_vm3, %v4588_v26, 0 }
 0x7b6   : > { %3883 = vrcp.f32 %v2050_v61 }
 0x7c2   : > { %v4582_v58 = vpop.eup %3881 }
 0x7c3   : > { %v2093_v60 = vsel %vm1954_vm2, %v4582_v58, 0.0  ;;  %v3884_v62 = vpop.eup %3883 }
 0x7c4   : > { %2094 = vadd.xlane.f32.xlu1 %v2093_v60  ;;  %v2112_v0 = vmul.f32 %v3884_v62, %v4493_v38 }
 0x7d5   : > { %2480 = vrot.lane.b32.xlu1 %v4334_v40, %s3965_s5  ;;  %s4867_s5 = sld [smem:[#allocation17_spill]] (!%p3398_p5) }
 0x7e5   : > { %v2053_v35 = vpop.xlane.xlu1 %2052 }
 0x7e6   : > { %3885 = vrcp.f32 %v2053_v35 }
 0x7f3   : > { %v3886_v21 = vpop.eup %3885 }
 0x7f4   : > { %v2113_v1 = vmul.f32 %v3886_v21, %v4506_v39 }
 0x7f6   : > { %v2128_v3 = vpack.c.bf16 %v2113_v1, %v2112_v0 }
 0x7f8   : > { %3616 = vmatmul.mubr.msk.bf16.vlgmr.msra.gmra.mxu1 %vm1950_vm0, %v2128_v3  ;;  %v2056_v40 = vpop.xlane.xlu0 %2055 }
 0x7f9   : > { %3626 = vmatpush3.bf16.msra.mxu1 %v2241_v49  ;;  %3627 = vmatprep.mubr.msk.bf16.mxu1 %vm3962_vm13, %v3959_v7  ;;  %3887 = vrcp.f32 %v2056_v40 }
 0x7fa   : > { %3637 = vmatprep.subr.bf16.mxu1 %v3959_v7 }
 0x7fc   : > { %v2059_v46 = vpop.xlane.xlu1 %2058 }
 0x7fd   : > { %3889 = vrcp.f32 %v2059_v46 }
 0x800   : > { %v2062_v4 = vpop.xlane.xlu0 %2061  ;;  %v2065_v8 = vpop.xlane.xlu1 %2064 }
 0x801   : > { %3891 = vrcp.f32 %v2062_v4 }
 0x802   : > { %3893 = vrcp.f32 %v2065_v8 }
 0x804   : > { %v2071_v38 = vpop.xlane.xlu1 %2070 }
 0x805   : > { %v2068_v39 = vpop.xlane.xlu0 %2067  ;;  %3895 = vrcp.f32 %v2071_v38 }
 0x806   : > { %3897 = vrcp.f32 %v2068_v39  ;;  %v3888_v55 = vpop.eup %3887 }
 0x807   : > { %v2114_v16 = vmul.f32 %v3888_v55, %v4518_v34 }
 0x808   : > { %v2077_v9 = vpop.xlane.xlu1 %2076 }
 0x809   : > { %v2074_v11 = vpop.xlane.xlu0 %2073  ;;  %3899 = vrcp.f32 %v2077_v9 }
 0x80a   : > { %v3890_v12 = vpop.eup %3889  ;;  %3901 = vrcp.f32 %v2074_v11 }
 0x80b   : > { %v2115_v20 = vmul.f32 %v3890_v12, %v4524_v56 }
 0x80c   : > { %v2083_v10 = vpop.xlane.xlu1 %2082 }
 0x80d   : > { %v2080_v6 = vpop.xlane.xlu0 %2079  ;;  %3903 = vrcp.f32 %v2083_v10  ;;  %v2129_v25 = vpack.c.bf16 %v2115_v20, %v2114_v16 }
 0x80e   : > { %v3892_v24 = vpop.eup %3891  ;;  %3905 = vrcp.f32 %v2080_v6 }
 0x80f   : > { %v3894_v30 = vpop.eup %3893  ;;  %v2116_v31 = vmul.f32 %v3892_v24, %v4532_v23  ;;  %3622 = vmatmul.mubr.msk.bf16.vlgmr.msra.gmra.mxu0 %vm1950_vm0, %v2129_v25  ;;  %v2339_v23 = vsel %vm2141_vm3, %v2334_v28, 0 }
 0x810   : > { %v2117_v19 = vmul.f32 %v3894_v30, %v4528_v17  ;;  %3632 = vmatpush3.bf16.msra.mxu0 %v2290_v59  ;;  %v2089_v18 = vpop.xlane.xlu1 %2088  ;;  %3633 = vmatprep.mubr.msk.bf16.mxu0 %vm3962_vm13, %v3959_v7 }
 0x811   : > { %v2086_v34 = vpop.xlane.xlu0 %2085  ;;  %3907 = vrcp.f32 %v2089_v18  ;;  %3643 = vmatprep.subr.bf16.mxu0 %v3959_v7 }
 0x812   : > { %v2130_v56 = vpack.c.bf16 %v2117_v19, %v2116_v31  ;;  %v3896_v37 = vpop.eup %3895  ;;  %3909 = vrcp.f32 %v2086_v34 }
 0x813   : > { %v3898_v22 = vpop.eup %3897  ;;  %v2119_v14 = vmul.f32 %v3896_v37, %v4540_v32 }
 0x814   : > { %3628 = vmatmul.mubr.msk.bf16.vlgmr.msra.gmra.mxu1 %vm1950_vm0, %v2130_v56  ;;  %v2118_v13 = vmul.f32 %v3898_v22, %v4542_v33 }
 0x815   : > { %3638 = vmatpush3.bf16.msra.mxu1 %v2339_v23  ;;  %v2092_v17 = vpop.xlane.xlu0 %2091  ;;  %3639 = vmatprep.mubr.msk.bf16.mxu1 %vm3962_vm13, %v3959_v7  ;;  %v3833_v23 = vld [vmem:[%s4861_s2 + $0x8] sm:$0xff]  }
 0x816   : > { %3649 = vmatprep.subr.bf16.mxu1 %v3959_v7  ;;  %v3900_v29 = vpop.eup %3899  ;;  %v2131_v2 = vpack.c.bf16 %v2119_v14, %v2118_v13  ;;  %3911 = vrcp.f32 %v2092_v17  ;;  %v3834_v13 = vld [vmem:[%s4861_s2] sm:$0xff]   ;;  %s4863_s2 = scalar_lea.vmem %s4811_s19, %s4106_s27 }
 0x817   : > { %v3902_v41 = vpop.eup %3901  ;;  %v2121_v44 = vmul.f32 %v3900_v29, %v4550_v27 }
 0x818   : > { %3634 = vmatmul.mubr.msk.bf16.vlgmr.msra.gmra.mxu0 %vm1950_vm0, %v2131_v2  ;;  %v2120_v5 = vmul.f32 %v3902_v41, %v4552_v63 }
 0x819   : > { %v2432_v32 = vpop.permute.xlu0 %2431  ;;  %3644 = vmatpush3.bf16.msra.mxu0 %v2388_v45  ;;  %3645 = vmatprep.mubr.msk.bf16.mxu0 %vm3962_vm13, %v3959_v7 }
 0x81a   : > { %v3904_v33 = vpop.eup %3903  ;;  %v2437_v48 = vsel %vm2141_vm3, %v2432_v32, 0  ;;  %v2132_v51 = vpack.c.bf16 %v2121_v44, %v2120_v5  ;;  %3655 = vmatprep.subr.bf16.mxu0 %v3959_v7 }
 0x81b   : > { %v3906_v52 = vpop.eup %3905  ;;  %v2123_v27 = vmul.f32 %v3904_v33, %v4559_v42 }
 0x81c   : > { %3640 = vmatmul.mubr.msk.bf16.vlgmr.msra.gmra.mxu1 %vm1950_vm0, %v2132_v51  ;;  %v2122_v53 = vmul.f32 %v3906_v52, %v4561_v43 }
 0x81d   : > { %3650 = vmatpush3.bf16.msra.mxu1 %v2437_v48  ;;  %3651 = vmatprep.mubr.msk.bf16.mxu1 %vm3962_vm13, %v3959_v7 }
 0x81e   : > { %v3908_v63 = vpop.eup %3907  ;;  %v2133_v54 = vpack.c.bf16 %v2123_v27, %v2122_v53  ;;  %3661 = vmatprep.subr.bf16.mxu1 %v3833_v23 }
 0x81f   : > { %v3910_v15 = vpop.eup %3909  ;;  %v2125_v57 = vmul.f32 %v3908_v63, %v4567_v36 }
 0x820   : > { %3646 = vmatmul.mubr.msk.bf16.vlgmr.msra.gmra.mxu0 %vm1950_vm0, %v2133_v54  ;;  %v2124_v60 = vmul.f32 %v3910_v15, %v4569_v47 }
 0x821   : > { %3657 = vmatprep.mubr.msk.bf16.mxu0 %vm3962_vm13, %v3959_v7 }
 0x822   : > { %v2134_v42 = vpack.c.bf16 %v2125_v57, %v2124_v60 }
 0x823   : > { %v3912_v26 = vpop.eup %3911 }
 0x824   : > { %3652 = vmatmul.mubr.msk.bf16.vlgmr.msra.gmra.mxu1 %vm1950_vm0, %v2134_v42  ;;  %v2126_v36 = vmul.f32 %v3912_v26, %v4575_v50 }
 0x825   : > { %3662 = vmatpush3.bf16.msra.mxu1 %v3833_v23 }
 0x826   : > { %3663 = vmatprep.subr.bf16.mxu1 %v3834_v13 }
 0x829   : > { %3664 = vmatpush3.bf16.msra.mxu1 %v3834_v13 }
 0x84d   : > { %v2095_v43 = vpop.xlane.xlu1 %2094 }
 0x84e   : > { %3913 = vrcp.f32 %v2095_v43 }
 0x851   : > { %v2481_v28 = vpop.permute.xlu1 %2480 }
 0x852   : > { %v2486_v61 = vsel %vm2141_vm3, %v2481_v28, 0 }
 0x853   : > { %3656 = vmatpush3.bf16.msra.mxu0 %v2486_v61 }
 0x85b   : > { %v3914_v35 = vpop.eup %3913 }
 0x85c   : > { %v2127_v62 = vmul.f32 %v3914_v35, %v4582_v58 }
 0x85e   : > { %v2135_v47 = vpack.c.bf16 %v2127_v62, %v2126_v36 }
 0x860   : > { %3658 = vmatmul.mubr.msk.bf16.vlgmr.msra.gmra.mxu0 %vm1950_vm0, %v2135_v47 }
 0x8b8   : > { %v4637_v7 = vpop.f32.mrf.mxu1 }
 0x8ba   : > { %v3617_v21 = vpop.f32.mrf.mxu1 }
 0x8bc   : > { %v4639_v0 = vpop.f32.mrf.mxu1 }
 0x8be   : > { %v3618_v1 = vpop.f32.mrf.mxu1 }
 0x8cf   : > { %v2228_v3 = vpop.f32.mrf.mxu0 }
 0x8d1   : > { %v3623_v49 = vpop.f32.mrf.mxu0 }
 0x8d3   : > { %v2231_v40 = vpop.f32.mrf.mxu0 }
 0x8d4   : > { %v2277_v46 = vpop.f32.mrf.mxu1  ;;  %v3801_v4 = vpack.i.bf16 %v2228_v3, %v2231_v40 }
 0x8d5   : > { %v3624_v8 = vpop.f32.mrf.mxu0 }
 0x8d6   : > { %v3629_v38 = vpop.f32.mrf.mxu1  ;;  %3802 = vrot.lane.b32.xlu0 %v3801_v4, %s3966_s23 }
 0x8d8   : > { %v2280_v50 = vpop.f32.mrf.mxu1  ;;  %v2326_v58 = vpop.f32.mrf.mxu0 }
 0x8d9   : > { %v3811_v56 = vpack.i.bf16 %v2277_v46, %v2280_v50 }
 0x8da   : > { %v3630_v39 = vpop.f32.mrf.mxu1  ;;  %v3635_v55 = vpop.f32.mrf.mxu0 }
 0x8dc   : > { %v2329_v9 = vpop.f32.mrf.mxu0  ;;  %v2375_v11 = vpop.f32.mrf.mxu1 }
 0x8dd   : > { %v3826_v12 = vpack.i.bf16 %v2326_v58, %v2329_v9 }
 0x8de   : > { %v3636_v16 = vpop.f32.mrf.mxu0  ;;  %v3641_v20 = vpop.f32.mrf.mxu1 }
 0x8df   : > { %v3927_v16 = vld [vmem:[#allocation2] sm:$0xff] }
 0x8e0   : > { %v2378_v10 = vpop.f32.mrf.mxu1  ;;  %v2424_v6 = vpop.f32.mrf.mxu0 }
 0x8e2   : > { %v3642_v24 = vpop.f32.mrf.mxu1  ;;  %v3647_v25 = vpop.f32.mrf.mxu0 }
 0x8e4   : > { %v2427_v30 = vpop.f32.mrf.mxu0  ;;  %v2473_v31 = vpop.f32.mrf.mxu1 }
 0x8e5   : > { %v3806_v59 = vpack.i.bf16 %v2427_v30, %v2424_v6  ;;  %v3928_v6 = vld [vmem:[#allocation2 + $0x10] sm:$0xff] }
 0x8e6   : > { %v3648_v19 = vpop.f32.mrf.mxu0  ;;  %v3653_v18 = vpop.f32.mrf.mxu1 }
 0x8e7   : > { %3807 = vrot.lane.b32.xlu0 %v3806_v59, %s3966_s23 }
 0x8e8   : > { %v2476_v34 = vpop.f32.mrf.mxu1 }
 0x8e9   : > { %v3816_v37 = vpack.i.bf16 %v2476_v34, %v2473_v31  ;;  %v3929_v31 = vld [vmem:[#allocation2 + $0x8] sm:$0xff] }
 0x8ea   : > { %v3654_v22 = vpop.f32.mrf.mxu1 }
 0x8eb   : > { %3812 = vrot.lane.b32.xlu0 %v3811_v56, %s3967_s3  ;;  %3817 = vrot.lane.b32.xlu1 %v3816_v37, %s3967_s3 }
 0x920   : > { %v2522_v14 = vpop.f32.mrf.mxu0 }
 0x922   : > { %v3659_v17 = vpop.f32.mrf.mxu0 }
 0x924   : > { %v2525_v29 = vpop.f32.mrf.mxu0 }
 0x925   : > { %v3821_v2 = vpack.i.bf16 %v2525_v29, %v2522_v14 }
 0x926   : > { %v3660_v41 = vpop.f32.mrf.mxu0 }
 0x927   : > { %3822 = vrot.lane.b32.xlu1 %v3821_v2, %s3968_s14 }
 0x92b   : > { %3827 = vrot.lane.b32.xlu1 %v3826_v12, %s3968_s14  ;;  %s4864_s14 = scalar_lea.vmem %s4813_s21, %s4106_s27 }
 0x948   : > { %v3803_v44 = vpop.permute.xlu0 %3802 }
 0x949   : > { %v3805_v27 = vunpack.i.h.bf16 %v3803_v44  ;;  %v3804_v53 = vunpack.i.l.bf16 %v3803_v44 }
 0x94b   : > { %v2553_v21 = vsel %vm1509_vm14, %v4637_v7, %v3805_v27  ;;  %v2554_v1 = vsel %vm1509_vm14, %v4639_v0, %v3804_v53  ;;  %v3377_v0 = vld [vmem:[%s4862_s25] ss:$0 sm:$0xff] }
 0x959   : > { %v3808_v45 = vpop.permute.xlu0 %3807 }
 0x95a   : > { %v3810_v5 = vunpack.i.h.bf16 %v3808_v45  ;;  %v3809_v33 = vunpack.i.l.bf16 %v3808_v45 }
 0x95c   : > { %v2586_v54 = vsel %vm1509_vm14, %v2378_v10, %v3810_v5  ;;  %v2585_v15 = vsel %vm1509_vm14, %v2375_v11, %v3809_v33  ;;  %v3835_v33 = vld [vmem:[%s4146_s12 + $0x8] sm:$0xff]  }
 0x95d   : > { %v3818_v32 = vpop.permute.xlu1 %3817  ;;  %v3813_v52 = vpop.permute.xlu0 %3812  ;;  %3669 = vmatprep.subr.bf16.mxu0 %v3835_v33 }
 0x95e   : > { %v3820_v48 = vunpack.i.h.bf16 %v3818_v32  ;;  %v3819_v51 = vunpack.i.l.bf16 %v3818_v32  ;;  %v3815_v28 = vunpack.i.h.bf16 %v3813_v52  ;;  %v3814_v61 = vunpack.i.l.bf16 %v3813_v52  ;;  %3670 = vmatpush3.bf16.msra.mxu0 %v3835_v33 }
 0x960   : > { %v2587_v42 = vsel %vm2555_vm4, %v2585_v15, %v3819_v51  ;;  %v2588_v43 = vsel %vm2555_vm4, %v2586_v54, %v3820_v48  ;;  %v2556_v40 = vsel %vm2555_vm4, %v2553_v21, %v3815_v28  ;;  %v2557_v46 = vsel %vm2555_vm4, %v2554_v1, %v3814_v61  ;;  %v3836_v48 = vld [vmem:[%s4146_s12] sm:$0xff]   ;;  %s4866_s12 = sld [smem:[#allocation16_spill]] (!%p3398_p5) }
 0x961   : > { %3671 = vmatprep.subr.bf16.mxu0 %v3836_v48  ;;  %v3382_v28 = vld [vmem:[%s875_s22] ss:$0 sm:$0xff] }
 0x962   : > { %3672 = vmatpush3.bf16.msra.mxu0 %v3836_v48 }
 0x999   : > { %v3823_v63 = vpop.permute.xlu1 %3822 }
 0x99a   : > { %v3825_v57 = vunpack.i.h.bf16 %v3823_v63  ;;  %v3824_v60 = vunpack.i.l.bf16 %v3823_v63 }
 0x99c   : > { %v2589_v26 = vsel %vm2558_vm5, %v2587_v42, %v3824_v60  ;;  %v2590_v35 = vsel %vm2558_vm5, %v2588_v43, %v3825_v57 }
 0x99d   : > { %v2593_v36 = vrot.slane %v2589_v26, 4  ;;  %v2594_v62 = vrot.slane %v2590_v35, 4  ;;  %v3828_v47 = vpop.permute.xlu1 %3827 }
 0x99e   : > { %v3830_v3 = vunpack.i.h.bf16 %v3828_v47  ;;  %v3829_v49 = vunpack.i.l.bf16 %v3828_v47  ;;  %v3383_v47 = vld [vmem:[%s878_s8] ss:$0 sm:$0xff]  ;;  %s4868_s8 = sld [smem:[#allocation18_spill]] (!%p3398_p5) }
 0x99f   : > { %v2595_v4 = vsel %vm1474_vm12, %v2593_v36, %v2594_v62 }
 0x9a0   : > { %v2559_v8 = vsel %vm2558_vm5, %v2556_v40, %v3830_v3  ;;  %v2560_v38 = vsel %vm2558_vm5, %v2557_v46, %v3829_v49  ;;  %v2600_v39 = vpack.c.bf16 %v2595_v4, %v2595_v4 }
 0x9a1   : > { %v2598_v50 = vsel %vm1474_vm12, %v2560_v38, %v2593_v36  ;;  %v3838_v38 = vld [vmem:[%s4156_s29 + $0x30] sm:$0xff]  }
 0x9a2   : > { %v2599_v58 = vpack.c.bf16 %v2598_v50, %v2559_v8  ;;  %v3837_v8 = vld [vmem:[%s4156_s29 + $0x38] sm:$0xff]   ;;  %v3839_v50 = vld [vmem:[%s4156_s29 + $0x28] sm:$0xff]  }
 0x9a3   : > { %3677 = vmatprep.subr.bf16.mxu1 %v3837_v8 }
 0x9a4   : > { %3665 = vmatprep.mubr.msk.bf16.mxu1 %vm1315_vm11, %v2599_v58  ;;  %v3840_v58 = vld [vmem:[%s4156_s29 + $0x20] sm:$0xff]  }
 0x9a5   : > { %3666 = vmatmul.mubr.msk.bf16.vlgmr.msra.gmra.mxu1 %vm1315_vm11, %v2600_v39  ;;  %v3841_v39 = vld [vmem:[%s4156_s29 + $0x18] sm:$0xff]  }
 0x9a6   : > { %3678 = vmatpush3.bf16.msra.mxu1 %v3837_v8 }
 0x9a7   : > { %3679 = vmatprep.subr.bf16.mxu1 %v3838_v38 }
 0x9aa   : > { %3680 = vmatpush3.bf16.msra.mxu1 %v3838_v38 }
 0x9ab   : > { %3681 = vmatprep.subr.bf16.mxu1 %v3839_v50 }
 0x9ae   : > { %3682 = vmatpush3.bf16.msra.mxu1 %v3839_v50 }
 0x9af   : > { %3683 = vmatprep.subr.bf16.mxu1 %v3840_v58 }
 0x9b2   : > { %3684 = vmatpush3.bf16.msra.mxu1 %v3840_v58 }
 0x9b3   : > { %3685 = vmatprep.subr.bf16.mxu1 %v3841_v39 }
 0x9b6   : > { %3686 = vmatpush3.bf16.msra.mxu1 %v3841_v39 }
 0xa65   : > { %v3667_v7 = vpop.f32.mrf.mxu1 }
 0xa66   : > { %v2673_v9 = vadd.f32 %v3667_v7, %v3377_v0  ;;  %v3842_v7 = vld [vmem:[%s4156_s29 + $0x10] sm:$0xff]  }
 0xa67   : > { %v2664_v55 = vpop.f32.mrf.mxu1  ;;  %3687 = vmatprep.subr.bf16.mxu1 %v3842_v7 }
 0xa68   : > { %v2665_v11 = vadd.f32 %v3377_v0, %v2664_v55  ;;  %v4668_v24 = vadd.f32 %v3928_v6, %v2673_v9  ;;  %3688 = vmatpush3.bf16.msra.mxu1 %v3842_v7  ;;  %v3844_v55 = vld [vmem:[%s4156_s29] sm:$0xff]  }
 0xa69   : > { %v3668_v12 = vpop.f32.mrf.mxu1  ;;  %v3384_v9 = vld [vmem:[%s4863_s2] ss:$0 sm:$0xff] }
 0xa6a   : > { %v4666_v20 = vadd.f32 %v3927_v16, %v2665_v11  ;;  %v2689_v18 = vsel %vm1315_vm11, %v4668_v24, 0.0 }
 0xa6b   : > { %v2667_v10 = vpop.f32.mrf.mxu1 }
 0xa6c   : > { %v2668_v25 = vadd.f32 %v3377_v0, %v2667_v10  ;;  %v2683_v30 = vsel %vm1315_vm11, %v4666_v20, 0.0  ;;  %v3843_v0 = vld [vmem:[%s4156_s29 + $0x8] sm:$0xff]  }
 0xa6d   : > { %2684 = vadd.xlane.f32.xlu0 %v2683_v30  ;;  %3689 = vmatprep.subr.bf16.mxu1 %v3843_v0 }
 0xa6e   : > { %v4672_v59 = vadd.f32 %v3929_v31, %v2668_v25  ;;  %3690 = vmatpush3.bf16.msra.mxu1 %v3843_v0 }
 0xa6f   : > { %3691 = vmatprep.subr.bf16.mxu1 %v3844_v55 }
 0xa70   : > { %v2686_v19 = vsel %vm1315_vm11, %v4672_v59, 0.0 }
 0xa71   : > { %2687 = vadd.xlane.f32.xlu1 %v2686_v19  ;;  %2690 = vadd.xlane.f32.xlu0 %v2689_v18 }
 0xa72   : > { %3692 = vmatpush3.bf16.msra.mxu1 %v3844_v55 }
 0xaf6   : > { %v2685_v34 = vpop.xlane.xlu0 %2684 }
 0xaf7   : > { %v2692_v56 = vmul.f32 0.03125, %v2685_v34 }
 0xaf9   : > { %v2695_v37 = vsub.f32 %v4666_v20, %v2692_v56 }
 0xafa   : > { %v2688_v22 = vpop.xlane.xlu1 %2687  ;;  %v2691_v23 = vpop.xlane.xlu0 %2690 }
 0xafb   : > { %v2693_v14 = vmul.f32 0.03125, %v2688_v22  ;;  %v2694_v17 = vmul.f32 0.03125, %v2691_v23  ;;  %v2698_v13 = vmul.f32 %v2695_v37, %v2695_v37 }
 0xafd   : > { %v2696_v29 = vsub.f32 %v4672_v59, %v2693_v14  ;;  %v2697_v2 = vsub.f32 %v4668_v24, %v2694_v17  ;;  %v2701_v41 = vsel %vm1315_vm11, %v2698_v13, 0.0 }
 0xafe   : > { %2702 = vadd.xlane.f32.xlu0 %v2701_v41 }
 0xaff   : > { %v2699_v44 = vmul.f32 %v2696_v29, %v2696_v29  ;;  %v2700_v45 = vmul.f32 %v2697_v2, %v2697_v2 }
 0xb01   : > { %v2704_v32 = vsel %vm1315_vm11, %v2699_v44, 0.0  ;;  %v2707_v5 = vsel %vm1315_vm11, %v2700_v45, 0.0 }
 0xb02   : > { %2705 = vadd.xlane.f32.xlu0 %v2704_v32  ;;  %2708 = vadd.xlane.f32.xlu1 %v2707_v5 }
 0xb87   : > { %v2703_v51 = vpop.xlane.xlu0 %2702 }
 0xb88   : > { %v2710_v52 = vmul.f32 0.03125, %v2703_v51 }
 0xb8a   : > { %v2713_v27 = vadd.f32 1e-05, %v2710_v52 }
 0xb8b   : > { %v2709_v53 = vpop.xlane.xlu1 %2708  ;;  %v2706_v63 = vpop.xlane.xlu0 %2705 }
 0xb8c   : > { %3915 = vrsqrt.f32 %v2713_v27  ;;  %v2712_v54 = vmul.f32 0.03125, %v2709_v53  ;;  %v2711_v15 = vmul.f32 0.03125, %v2706_v63 }
 0xb8e   : > { %v2715_v57 = vadd.f32 1e-05, %v2712_v54  ;;  %v2714_v60 = vadd.f32 1e-05, %v2711_v15 }
 0xb90   : > { %3917 = vrsqrt.f32 %v2715_v57 }
 0xb91   : > { %3919 = vrsqrt.f32 %v2714_v60 }
 0xb99   : > { %v3916_v42 = vpop.eup %3915 }
 0xb9a   : > { %v2719_v43 = vmul.f32 %v3916_v42, %v2695_v37  ;;  %v3389_v42 = vld [vmem:[%s4864_s14] ss:$0 sm:$0xff] }
 0xb9c   : > { %v2728_v62 = vmul.f32 %v3382_v28, %v2719_v43 }
 0xb9d   : > { %v3918_v61 = vpop.eup %3917 }
 0xb9e   : > { %v3920_v26 = vpop.eup %3919  ;;  %v2721_v35 = vmul.f32 %v3918_v61, %v2697_v2  ;;  %v2737_v49 = vadd.f32 %v3383_v47, %v2728_v62 }
 0xb9f   : > { %v2720_v36 = vmul.f32 %v3920_v26, %v2696_v29 }
 0xba0   : > { %v2730_v21 = vmul.f32 %v3382_v28, %v2721_v35 }
 0xba1   : > { %v2729_v1 = vmul.f32 %v3382_v28, %v2720_v36 }
 0xba2   : > { %v2739_v3 = vadd.f32 %v3383_v47, %v2730_v21 }
 0xba3   : > { %v2738_v40 = vadd.f32 %v3383_v47, %v2729_v1 }
 0xba4   : > { %v2741_v46 = vpack.c.bf16 %v2739_v3, %v2739_v3 }
 0xba5   : > { %v2740_v4 = vpack.c.bf16 %v2738_v40, %v2737_v49 }
 0xba7   : > { %3673 = vmatprep.mubr.msk.bf16.mxu0 %vm1315_vm11, %v2740_v4 }
 0xba8   : > { %3674 = vmatmul.mubr.msk.bf16.vlgmr.msra.gmra.mxu0 %vm1315_vm11, %v2741_v46 }
 0xc68   : > { %v3675_v11 = vpop.f32.mrf.mxu0 }
 0xc69   : > { %v2814_v12 = vadd.f32 %v3675_v11, %v3384_v9 }
 0xc6a   : > { %v2805_v16 = vpop.f32.mrf.mxu0 }
 0xc6b   : > { %v2824_v10 = vmul.f32 0.044715, %v2814_v12  ;;  %v2806_v6 = vadd.f32 %v3384_v9, %v2805_v16  ;;  %v2821_v51 = vmul.f32 0.5, %v2814_v12 }
 0xc6c   : > { %v3676_v25 = vpop.f32.mrf.mxu0 }
 0xc6d   : > { %v2827_v30 = vmul.f32 %v2824_v10, %v2814_v12  ;;  %v2822_v31 = vmul.f32 0.044715, %v2806_v6  ;;  %v2819_v52 = vmul.f32 0.5, %v2806_v6 }
 0xc6e   : > { %v2808_v19 = vpop.f32.mrf.mxu0 }
 0xc6f   : > { %v2830_v18 = vmul.f32 %v2827_v30, %v2814_v12  ;;  %v2825_v34 = vmul.f32 %v2822_v31, %v2806_v6  ;;  %v2809_v56 = vadd.f32 %v3384_v9, %v2808_v19 }
 0xc71   : > { %v2833_v37 = vadd.f32 %v2830_v18, %v2814_v12  ;;  %v2828_v22 = vmul.f32 %v2825_v34, %v2806_v6  ;;  %v2823_v23 = vmul.f32 0.044715, %v2809_v56  ;;  %v2820_v27 = vmul.f32 0.5, %v2809_v56 }
 0xc73   : > { %v2836_v14 = vmul.f32 0.7978846, %v2833_v37  ;;  %v2826_v17 = vmul.f32 %v2823_v23, %v2809_v56  ;;  %v2831_v13 = vadd.f32 %v2828_v22, %v2806_v6 }
 0xc75   : > { %v2829_v29 = vmul.f32 %v2826_v17, %v2809_v56  ;;  %v2834_v2 = vmul.f32 0.7978846, %v2831_v13  ;;  %3921 = vtanh.f32 %v2836_v14 }
 0xc77   : > { %v2832_v41 = vadd.f32 %v2829_v29, %v2809_v56  ;;  %3923 = vtanh.f32 %v2834_v2 }
 0xc79   : > { %v2835_v44 = vmul.f32 0.7978846, %v2832_v41 }
 0xc7b   : > { %3925 = vtanh.f32 %v2835_v44 }
 0xc82   : > { %v3922_v45 = vpop.eup %3921 }
 0xc83   : > { %v2842_v5 = vadd.f32 1.0, %v3922_v45 }
 0xc84   : > { %v3924_v32 = vpop.eup %3923 }
 0xc85   : > { %v2840_v33 = vadd.f32 1.0, %v3924_v32  ;;  %v2845_v63 = vmul.f32 %v2842_v5, %v2821_v51 }
 0xc87   : > { %v2843_v54 = vmul.f32 %v2840_v33, %v2819_v52  ;;  %v2847_v60 = vpack.c.bf16 %v2845_v63, %v2845_v63 }
 0xc88   : > { %v3926_v48 = vpop.eup %3925 }
 0xc89   : > { %v2841_v53 = vadd.f32 1.0, %v3926_v48 }
 0xc8b   : > { %v2844_v15 = vmul.f32 %v2841_v53, %v2820_v27 }
 0xc8d   : > { %v2846_v57 = vpack.c.bf16 %v2844_v15, %v2843_v54 }
 0xc8f   : > { %3693 = vmatprep.mubr.bf16.mxu1 %v2846_v57 }
 0xc90   : > { %3694 = vmatmul.mubr.bf16.vlgmr.msra.gmra.mxu1 %v2847_v60 }
 0xd50   : > { %v3695_v43 = vpop.f32.mrf.mxu1 }
 0xd51   : > { %v2962_v28 = vadd.f32 %v3695_v43, %v3389_v42 }
 0xd52   : > { %v2953_v61 = vpop.f32.mrf.mxu1 }
 0xd53   : > { %v2969_v26 = vadd.f32 %v2962_v28, %v4668_v24  ;;  %v2954_v35 = vadd.f32 %v3389_v42, %v2953_v61 }
 0xd54   : > { %v3696_v36 = vpop.f32.mrf.mxu1 }
 0xd55   : > { %2972 = vst.msk [vmem:[#allocation2 + $0x10] sm:$0xff] %vm1315_vm11, %v2969_v26  ;;  %v2967_v62 = vadd.f32 %v2954_v35, %v4666_v20 }
 0xd56   : > { %v2956_v47 = vpop.f32.mrf.mxu1 }
 0xd57   : > { %2970 = vst.msk [vmem:[#allocation2] sm:$0xff] %vm1315_vm11, %v2967_v62  ;;  %v2957_v21 = vadd.f32 %v3389_v42, %v2956_v47  ;;  %2976 = sbr.rel (%p3398_p5) target bundleno = 3936 (0xf60), region = 124 }
 0xd59   : > { %v2968_v1 = vadd.f32 %v2957_v21, %v4672_v59 }
 0xd5b   : > { %2971 = vst.msk [vmem:[#allocation2 + $0x8] sm:$0xff] %vm1315_vm11, %v2968_v1 }
 0xd5c   : > { %v2979_v3 = vsel %vm1315_vm11, %v2967_v62, 0.0  ;;  %v2985_v24 = vsel %vm1315_vm11, %v2969_v26, 0.0  ;;  %v2982_v49 = vsel %vm1315_vm11, %v2968_v1, 0.0  ;;  %v3930_v20 = vld [vmem:[%s4865_s7 + $0x38] sm:$0xff]   ;;  %v3931_v59 = vld [vmem:[%s4865_s7 + $0x30] sm:$0xff]   ;;  %v3932_v4 = vld [vmem:[%s4865_s7 + $0x28] sm:$0xff]  }
 0xd5d   : > { %2980 = vadd.xlane.f32.xlu0 %v2979_v3  ;;  %2986 = vadd.xlane.f32.xlu1 %v2985_v24  ;;  %v3122_v40 = vsel %vm1315_vm11, %v3930_v20, 0  ;;  %v3119_v46 = vsel %vm1315_vm11, %v3931_v59, 0  ;;  %v3116_v8 = vsel %vm1315_vm11, %v3932_v4, 0  ;;  %v3933_v38 = vld [vmem:[%s4865_s7 + $0x20] sm:$0xff]   ;;  %v3934_v58 = vld [vmem:[%s4865_s7 + $0x18] sm:$0xff]   ;;  %v3935_v56 = vld [vmem:[%s4865_s7 + $0x10] sm:$0xff]  }
 0xd5e   : > { %3717 = vmatprep.subr.msk.bf16.mxu0 %vm1315_vm11, %v3930_v20  ;;  %v3113_v50 = vsel %vm1315_vm11, %v3933_v38, 0  ;;  %v3110_v34 = vsel %vm1315_vm11, %v3934_v58, 0  ;;  %v3107_v37 = vsel %vm1315_vm11, %v3935_v56, 0  ;;  %v3936_v22 = vld [vmem:[%s4865_s7 + $0x8] sm:$0xff]   ;;  %v3937_v14 = vld [vmem:[%s4865_s7] sm:$0xff]  }
 0xd5f   : > { %3698 = vmatpush3.bf16.xpose.msra.mxu0 %v3122_v40  ;;  %v3104_v23 = vsel %vm1315_vm11, %v3936_v22, 0  ;;  %v3101_v17 = vsel %vm1315_vm11, %v3937_v14, 0  ;;  %v3399_v52 = vld [vmem:[%s4866_s12] ss:$0 sm:$0xff] }
 0xd60   : > { %3718 = vmatprep.subr.msk.bf16.mxu0 %vm1315_vm11, %v3931_v59  ;;  %v3400_v57 = vld [vmem:[%s4867_s5] ss:$0 sm:$0xff] }
 0xd61   : > { %2983 = vadd.xlane.f32.xlu0 %v2982_v49 }
 0xd67   : > { %3700 = vmatpush3.bf16.xpose.msra.mxu0 %v3119_v46 }
 0xd68   : > { %3719 = vmatprep.subr.msk.bf16.mxu0 %vm1315_vm11, %v3932_v4 }
 0xd6f   : > { %3702 = vmatpush3.bf16.xpose.msra.mxu0 %v3116_v8 }
 0xd70   : > { %3720 = vmatprep.subr.msk.bf16.mxu0 %vm1315_vm11, %v3933_v38 }
 0xd77   : > { %3704 = vmatpush3.bf16.xpose.msra.mxu0 %v3113_v50 }
 0xd78   : > { %3721 = vmatprep.subr.msk.bf16.mxu0 %vm1315_vm11, %v3934_v58 }
 0xd7f   : > { %3706 = vmatpush3.bf16.xpose.msra.mxu0 %v3110_v34 }
 0xd80   : > { %3722 = vmatprep.subr.msk.bf16.mxu0 %vm1315_vm11, %v3935_v56 }
 0xd87   : > { %3708 = vmatpush3.bf16.xpose.msra.mxu0 %v3107_v37 }
 0xd88   : > { %3723 = vmatprep.subr.msk.bf16.mxu0 %vm1315_vm11, %v3936_v22 }
 0xd8f   : > { %3710 = vmatpush3.bf16.xpose.msra.mxu0 %v3104_v23 }
 0xd90   : > { %3724 = vmatprep.subr.msk.bf16.mxu0 %vm1315_vm11, %v3937_v14 }
 0xd97   : > { %3712 = vmatpush3.bf16.xpose.msra.mxu0 %v3101_v17 }
 0xde6   : > { %v2981_v39 = vpop.xlane.xlu0 %2980  ;;  %v2987_v7 = vpop.xlane.xlu1 %2986 }
 0xde7   : > { %v2988_v0 = vmul.f32 0.03125, %v2981_v39  ;;  %v2990_v55 = vmul.f32 0.03125, %v2987_v7 }
 0xde9   : > { %v2991_v9 = vsub.f32 %v2967_v62, %v2988_v0  ;;  %v2993_v11 = vsub.f32 %v2969_v26, %v2990_v55 }
 0xdea   : > { %v2984_v12 = vpop.xlane.xlu0 %2983 }
 0xdeb   : > { %v2989_v16 = vmul.f32 0.03125, %v2984_v12  ;;  %v2994_v10 = vmul.f32 %v2991_v9, %v2991_v9  ;;  %v2996_v6 = vmul.f32 %v2993_v11, %v2993_v11 }
 0xded   : > { %v2992_v25 = vsub.f32 %v2968_v1, %v2989_v16  ;;  %v2997_v30 = vsel %vm1315_vm11, %v2994_v10, 0.0  ;;  %v3003_v31 = vsel %vm1315_vm11, %v2996_v6, 0.0 }
 0xdee   : > { %2998 = vadd.xlane.f32.xlu1 %v2997_v30 }
 0xdef   : > { %v2995_v19 = vmul.f32 %v2992_v25, %v2992_v25 }
 0xdf1   : > { %v3000_v18 = vsel %vm1315_vm11, %v2995_v19, 0.0 }
 0xdf2   : > { %3004 = vadd.xlane.f32.xlu1 %v3003_v31  ;;  %3001 = vadd.xlane.f32.xlu0 %v3000_v18 }
 0xe77   : > { %v2999_v13 = vpop.xlane.xlu1 %2998 }
 0xe78   : > { %v3006_v29 = vmul.f32 0.03125, %v2999_v13 }
 0xe7a   : > { %v3009_v2 = vadd.f32 1e-05, %v3006_v29 }
 0xe7b   : > { %v3005_v41 = vpop.xlane.xlu1 %3004  ;;  %v3002_v44 = vpop.xlane.xlu0 %3001 }
 0xe7c   : > { %3938 = vrsqrt.f32 %v3009_v2  ;;  %v3008_v45 = vmul.f32 0.03125, %v3005_v41  ;;  %v3007_v32 = vmul.f32 0.03125, %v3002_v44 }
 0xe7e   : > { %v3011_v5 = vadd.f32 1e-05, %v3008_v45  ;;  %v3010_v33 = vadd.f32 1e-05, %v3007_v32 }
 0xe80   : > { %3940 = vrsqrt.f32 %v3011_v5 }
 0xe81   : > { %3942 = vrsqrt.f32 %v3010_v33 }
 0xe89   : > { %v3939_v48 = vpop.eup %3938 }
 0xe8a   : > { %v3015_v51 = vmul.f32 %v3939_v48, %v2991_v9 }
 0xe8c   : > { %v3024_v15 = vmul.f32 %v3399_v52, %v3015_v51 }
 0xe8d   : > { %v3941_v27 = vpop.eup %3940 }
 0xe8e   : > { %v3943_v53 = vpop.eup %3942  ;;  %v3017_v63 = vmul.f32 %v3941_v27, %v2993_v11  ;;  %v3033_v28 = vadd.f32 %v3400_v57, %v3024_v15 }
 0xe8f   : > { %v3016_v54 = vmul.f32 %v3943_v53, %v2992_v25 }
 0xe90   : > { %v3026_v60 = vmul.f32 %v3399_v52, %v3017_v63 }
 0xe91   : > { %v3025_v42 = vmul.f32 %v3399_v52, %v3016_v54 }
 0xe92   : > { %v3035_v43 = vadd.f32 %v3400_v57, %v3026_v60 }
 0xe93   : > { %v3034_v61 = vadd.f32 %v3400_v57, %v3025_v42 }
 0xe94   : > { %v3037_v26 = vpack.c.bf16 %v3035_v43, %v3035_v43 }
 0xe95   : > { %v3036_v35 = vpack.c.bf16 %v3034_v61, %v3033_v28 }
 0xe97   : > { %3713 = vmatprep.mubr.msk.bf16.mxu0 %vm1315_vm11, %v3036_v35 }
 0xe98   : > { %3714 = vmatmul.mubr.msk.bf16.vlgmr.msra.gmra.mxu0 %vm1315_vm11, %v3037_v26 }
 0xf58   : > { %v3715_v36 = vpop.f32.mrf.mxu0 }
 0xf59   : > { %3412 = vst [vmem:[%s4868_s8 + $0x14] sm:$0xff] %v3715_v36 }
 0xf5a   : > { %v3158_v62 = vpop.f32.mrf.mxu0 }
 0xf5b   : > { %3172 = vst [vmem:[%s4868_s8] sm:$0xff] %v3158_v62 }
 0xf5c   : > { %v3716_v47 = vpop.f32.mrf.mxu0 }
 0xf5e   : > { %v3161_v21 = vpop.f32.mrf.mxu0 }
 0xf5f   : > { %3173 = vst [vmem:[%s4868_s8 + $0x8] sm:$0xf] %v3161_v21  ;;  %3411 = vst [vmem:[%s4868_s8 + $0xc] sm:$0xf0] %v3161_v21 }
 0xf60 PF: > { %s4869_s7 = sld [smem:[#allocation3_spill]] }
 0xf66   : > { %s34_s5 = sadd.s32 1, %s4869_s7  }
 0xf67   : > { %p31_p6 = scmp.ge.s32.totalorder %s34_s5, 4  }
 0xf69   :  { %33 = sbr.rel (!%p31_p6) target bundleno = 15 (0xf), region = 184 }

</bundles_post_ra>
